<compile_context>
chip_gen: v7x
topology: tpu7x:2x2x1
jax: 0.10.0
libtpu: 0.0.40
codegen_flags: <defaults>
</compile_context>

<pallas_src>
import jax
import jax.numpy as jnp
from jax.experimental import pallas as pl
from jax.experimental.pallas import tpu as pltpu

LANE = 128  # lane-padded feature width for every layer


# ------------------------------- Pallas kernel -------------------------------

def _make_fused_kernel(n_conv):
    """Fused forward for one packed graph mini-batch:
    lin_in -> n_conv gConv layers -> mean-pool -> lin_pred."""

    def kernel(x_ref, a_ref, et_ref, p_ref, ic_ref, w_ref, b_ref, o_ref):
        # x_ref : (1, N, 128) bf16          node features (lane-padded)
        # a_ref : (1, N, N)   bf16          adjacency A[dst, src]
        # et_ref: (n_conv, N, 128) f32      per-layer edge term (+ conv bias)
        # p_ref : (1, G, N)   bf16          0/1 one-hot pooling matrix
        # ic_ref: (1, G, 128) f32           1/count per graph (lane-broadcast)
        # w_ref : (3+2*n_conv, 128, 128) bf16  [W1, W2, Wp, Wr_0, Wn_0, Wr_1, ...]
        # b_ref : (3, 1, 128) f32           [b1, b2, bp]

        # ---- lin_in: Linear -> ReLU -> Linear -> ReLU (bf16 MXU, f32 epilogue)
        h = jnp.dot(x_ref[0], w_ref[0],
                    preferred_element_type=jnp.float32) + b_ref[0]
        h = jnp.maximum(h, 0.0).astype(jnp.bfloat16)
        h = jnp.dot(h, w_ref[1],
                    preferred_element_type=jnp.float32) + b_ref[1]
        h = jnp.maximum(h, 0.0).astype(jnp.bfloat16)

        a = a_ref[0]  # (N, N) bf16, loop-invariant across conv layers

        # ---- gConv stack (unrolled at trace time; h never leaves VMEM/vregs)
        # TODO(synk): `gConv` is not defined in the provided source; implemented
        # as an edge-aware conv: out = ReLU(x@Wr + A@(x@Wn) + E_agg@We + b),
        # with 'add' aggregation.
        for li in range(n_conv):
            wr = w_ref[3 + 2 * li]
            wn = w_ref[4 + 2 * li]
            # reassociated neighbor term: A @ (h @ Wn) -- N^2 matmul at F_out
            hwn = jnp.dot(h, wn,
                          preferred_element_type=jnp.float32).astype(jnp.bfloat16)
            nbr = jnp.dot(a, hwn, preferred_element_type=jnp.float32)
            root = jnp.dot(h, wr, preferred_element_type=jnp.float32)
            h = jnp.maximum(root + nbr + et_ref[li], 0.0).astype(jnp.bfloat16)

        # ---- global_mean_pool (bf16 one-hot sum * f32 1/count) + lin_pred
        hs = jnp.dot(p_ref[0], h, preferred_element_type=jnp.float32)  # sums
        hg = (hs * ic_ref[0]).astype(jnp.bfloat16)                     # means
        o_ref[0] = jnp.dot(hg, w_ref[2],
                           preferred_element_type=jnp.float32) + b_ref[2]

    return kernel


# ------------------------------ pallas_call glue ------------------------------

def gcn_forward(weights, biases, x_pad, adj, e_term, pool_oh, inv_cnt, n_conv):
    """Single fused pallas_call; grid axis = independent packed mini-batches."""
    B, N, F = x_pad.shape
    G = pool_oh.shape[1]

    return pl.pallas_call(
        _make_fused_kernel(n_conv),
        out_shape=jax.ShapeDtypeStruct((B, G, F), jnp.float32),
        grid=(B,),
        in_specs=[
            pl.BlockSpec((1, N, F), lambda b: (b, 0, 0)),        # node features
            # TODO(synk): for much larger per-batch N, keep adj in HBM (pl.ANY)
            # and stream dst-row tiles (P3 accumulator) instead of one VMEM block.
            pl.BlockSpec((1, N, N), lambda b: (b, 0, 0)),        # adjacency
            pl.BlockSpec((n_conv, N, F), lambda b: (b, 0, 0)),   # per-layer edge terms
            pl.BlockSpec((1, G, N), lambda b: (b, 0, 0)),        # pool one-hot
            pl.BlockSpec((1, G, F), lambda b: (b, 0, 0)),        # 1/count (f32)
            pl.BlockSpec(weights.shape, lambda b: (0, 0, 0)),    # all 128x128 weights
            pl.BlockSpec(biases.shape, lambda b: (0, 0, 0)),     # b1/b2/bp
        ],
        out_specs=pl.BlockSpec((1, G, F), lambda b: (b, 0, 0)),
        compiler_params=pltpu.CompilerParams(
            dimension_semantics=("parallel",),
            vmem_limit_bytes=8 * 1024 * 1024),
    )(x_pad, adj, e_term, pool_oh, inv_cnt, weights, biases)
    # Note: weight/bias index_maps return the same block every grid step, so
    # they are fetched once; total VMEM footprint < 1 MiB, so default
    # double-buffering of the per-batch inputs is already cheap.


# ------------------------------ parameter init -------------------------------

def _init_linear(key, fan_in, fan_out):
    # deterministic uniform(-1/sqrt(fan_in), 1/sqrt(fan_in)), like torch Linear
    kw, kb = jax.random.split(key)
    bound = 1.0 / jnp.sqrt(jnp.float32(fan_in))
    w = jax.random.uniform(kw, (fan_in, fan_out), jnp.float32, -bound, bound)
    b = jax.random.uniform(kb, (fan_out,), jnp.float32, -bound, bound)
    return w, b


def _pad2(a, rows, cols):
    return jnp.zeros((rows, cols), a.dtype).at[:a.shape[0], :a.shape[1]].set(a)


def init_params(key, in_dim, emb_dim, conv_layer_filters, edge_dim, out_dim,
                fpad=LANE):
    """True-shape init, zero-padded to lane-dense (fpad) shapes and stacked.

    Returns:
      weights: (3 + 2*n_conv, fpad, fpad) bf16  [W1, W2, Wp, Wr_0, Wn_0, ...]
      biases : (3, 1, fpad) f32                 [b1, b2, bp]
      conv_we: list of TRUE-dim (edge_dim, f_out) edge-weight matrices
      conv_b : list of TRUE-dim (f_out,) conv biases (folded into edge terms)

    Zero-padded channels carry zero weights/bias, so they stay exactly zero
    through every ReLU and never contaminate real outputs.
    """
    n_conv = len(conv_layer_filters) - 1
    keys = jax.random.split(key, 3 + 3 * n_conv)

    w1, b1 = _init_linear(keys[0], in_dim, emb_dim)
    w2, b2 = _init_linear(keys[1], emb_dim, conv_layer_filters[0])
    wp, bp = _init_linear(keys[2], conv_layer_filters[-1], out_dim)

    w_list = [_pad2(w1, fpad, fpad), _pad2(w2, fpad, fpad), _pad2(wp, fpad, fpad)]
    conv_we, conv_b = [], []
    k = 3
    for i in range(n_conv):
        fi, fo = conv_layer_filters[i], conv_layer_filters[i + 1]
        wr, b = _init_linear(keys[k], fi, fo)
        wn, _ = _init_linear(keys[k + 1], fi, fo)
        we, _ = _init_linear(keys[k + 2], edge_dim, fo)
        w_list += [_pad2(wr, fpad, fpad), _pad2(wn, fpad, fpad)]
        conv_we.append(we)
        conv_b.append(b)
        k += 3

    weights = jnp.stack(w_list).astype(jnp.bfloat16)
    biases = jnp.stack([_pad2(b1[None, :], 1, fpad),
                        _pad2(b2[None, :], 1, fpad),
                        _pad2(bp[None, :], 1, fpad)])
    return weights, biases, conv_we, conv_b


def build_edge_terms(e_agg, conv_we, conv_b, fpad=LANE):
    """Per-layer additive edge term (E_agg @ We_i + b_i) at TRUE edge_dim,
    zero-padded to fpad lanes.  e_agg: (B, N, edge_dim) f32.
    Returns (B * n_conv, N, fpad) f32 (collapsed so the kernel indexes [li])."""
    B, N, _ = e_agg.shape
    terms = []
    for we, b in zip(conv_we, conv_b):
        t = jnp.einsum("bne,ef->bnf", e_agg, we) + b          # (B, N, f_out)
        t = jnp.pad(t, ((0, 0), (0, 0), (0, fpad - t.shape[-1])))
        terms.append(t)
    et = jnp.stack(terms, axis=1)                             # (B, n_conv, N, fpad)
    return et.reshape(B * len(terms), N, fpad)


# ----------------------------------- main ------------------------------------

if __name__ == "__main__":
    key = jax.random.PRNGKey(0)

    # model config (consistent with the module's __init__ signature)
    in_dim = 8
    emb_dim = 32
    conv_layer_filters = [32, 32, 16]     # -> 2 gConv layers
    edge_dim = 4
    out_dim = 4
    n_conv = len(conv_layer_filters) - 1

    # graph data: B independent packed mini-batches (parallel grid axis), each
    # with 8 graphs of 16 nodes (bidirectional rings) -> N = 128 nodes/batch,
    # so every matmul dimension is lane/sublane aligned.
    B = 2
    num_graphs = 8
    nodes_per_graph = 16
    N = num_graphs * nodes_per_graph

    kx, ke, kp = jax.random.split(key, 3)
    x = jax.random.normal(kx, (B, N, in_dim), jnp.float32)

    src, dst = [], []
    for g in range(num_graphs):
        base = g * nodes_per_graph
        for i in range(nodes_per_graph):
            u, v = base + i, base + (i + 1) % nodes_per_graph
            src += [u, v]
            dst += [v, u]
    src = jnp.array(src, jnp.int32)
    dst = jnp.array(dst, jnp.int32)
    E = src.shape[0]
    edge_attr = jax.random.normal(ke, (B, E, edge_dim), jnp.float32)

    # densify graph structure (plain-JAX glue):
    #   A[dst, src] += 1  (duplicate edges sum -> 'add' aggregation)
    #   E_agg[dst]  += edge_attr
    adj1 = jnp.zeros((N, N), jnp.float32).at[dst, src].add(1.0)
    adj = jnp.tile(adj1[None], (B, 1, 1)).astype(jnp.bfloat16)
    e_agg = jax.vmap(
        lambda ea: jnp.zeros((N, edge_dim), jnp.float32).at[dst].add(ea)
    )(edge_attr)

    # global_mean_pool: 0/1 one-hot (bf16 sums) + f32 reciprocal counts (means)
    batch_vec = jnp.repeat(jnp.arange(num_graphs, dtype=jnp.int32), nodes_per_graph)
    pool1 = (batch_vec[None, :] == jnp.arange(num_graphs)[:, None]).astype(jnp.float32)
    counts = jnp.maximum(pool1.sum(axis=1, keepdims=True), 1.0)      # (G, 1)
    pool_oh = jnp.tile(pool1[None], (B, 1, 1)).astype(jnp.bfloat16)   # (B, G, N)
    inv_cnt = jnp.tile((1.0 / counts)[None], (B, 1, LANE))            # (B, G, 128) f32

    weights, biases, conv_we, conv_b = init_params(
        kp, in_dim, emb_dim, conv_layer_filters, edge_dim, out_dim)

    # lane-pad node features; precompute per-layer edge terms at true edge_dim
    x_pad = jnp.zeros((B, N, LANE), jnp.float32).at[:, :, :in_dim].set(x)
    x_pad = x_pad.astype(jnp.bfloat16)
    e_term = build_edge_terms(e_agg, conv_we, conv_b)

    out_pad = gcn_forward(weights, biases, x_pad, adj, e_term, pool_oh, inv_cnt,
                          n_conv)
    out_pad = jax.block_until_ready(out_pad)
    out = out_pad[:, :, :out_dim].reshape(B * num_graphs, out_dim)   # strip padding
    assert out.shape == (B * num_graphs, out_dim)
    assert bool(jnp.all(jnp.isfinite(out)))
    print("KERNEL_OK")
</pallas_src>

<mosaic_0001>
module attributes {stable_mosaic.version = 11 : i64} {
  func.func @kernel(%arg0: i32, %arg1: memref<1x128x128xbf16, #tpu.memory_space<vmem>>, %arg2: memref<1x128x128xbf16, #tpu.memory_space<vmem>>, %arg3: memref<2x128x128xf32, #tpu.memory_space<vmem>>, %arg4: memref<1x8x128xbf16, #tpu.memory_space<vmem>>, %arg5: memref<1x8x128xf32, #tpu.memory_space<vmem>>, %arg6: memref<7x128x128xbf16, #tpu.memory_space<vmem>>, %arg7: memref<3x1x128xf32, #tpu.memory_space<vmem>>, %arg8: memref<1x8x128xf32, #tpu.memory_space<vmem>>) attributes {dimension_semantics = [#tpu.dimension_semantics<parallel>], iteration_bounds = array<i64: 2>, scalar_prefetch = 0 : i64, scratch_operands = 0 : i64, tpu.core_type = #tpu.core_type<tc>, window_params = [{transform_indices = @transform_0, window_bounds = array<i64: 1, 128, 128>}, {transform_indices = @transform_1, window_bounds = array<i64: 1, 128, 128>}, {transform_indices = @transform_2, window_bounds = array<i64: 2, 128, 128>}, {transform_indices = @transform_3, window_bounds = array<i64: 1, 8, 128>}, {transform_indices = @transform_4, window_bounds = array<i64: 1, 8, 128>}, {pipeline_mode = #tpu.pipeline_mode<synchronous>, transform_indices = @transform_5, window_bounds = array<i64: 7, 128, 128>}, {pipeline_mode = #tpu.pipeline_mode<synchronous>, transform_indices = @transform_6, window_bounds = array<i64: 3, 1, 128>}, {transform_indices = @transform_7, window_bounds = array<i64: 1, 8, 128>}]} {
    %c0 = arith.constant 0 : index
    %c0_0 = arith.constant 0 : index
    %c0_1 = arith.constant 0 : index
    %0 = vector.load %arg1[%c0, %c0_0, %c0_1] : memref<1x128x128xbf16, #tpu.memory_space<vmem>>, vector<1x128x128xbf16>
    %1 = vector.shape_cast %0 : vector<1x128x128xbf16> to vector<128x128xbf16>
    %c0_2 = arith.constant 0 : index
    %c0_3 = arith.constant 0 : index
    %c0_4 = arith.constant 0 : index
    %2 = vector.load %arg6[%c0_2, %c0_3, %c0_4] : memref<7x128x128xbf16, #tpu.memory_space<vmem>>, vector<1x128x128xbf16>
    %3 = vector.shape_cast %2 : vector<1x128x128xbf16> to vector<128x128xbf16>
    %cst = arith.constant dense<0.000000e+00> : vector<128x128xf32>
    %4 = tpu.matmul %1, %3, %cst {dimension_numbers = #tpu.dot_dimension_numbers<[1], [0], [0], [1], [0, 0, 1, 1], [], []>} : vector<128x128xbf16>, vector<128x128xbf16>, vector<128x128xf32> -> vector<128x128xf32>
    %c0_5 = arith.constant 0 : index
    %c0_6 = arith.constant 0 : index
    %c0_7 = arith.constant 0 : index
    %5 = vector.load %arg7[%c0_5, %c0_6, %c0_7] : memref<3x1x128xf32, #tpu.memory_space<vmem>>, vector<1x1x128xf32>
    %6 = vector.shape_cast %5 : vector<1x1x128xf32> to vector<1x128xf32>
    %7 = vector.broadcast %6 : vector<1x128xf32> to vector<128x128xf32>
    %8 = arith.addf %4, %7 : vector<128x128xf32>
    %cst_8 = arith.constant 0.000000e+00 : f32
    %9 = vector.broadcast %cst_8 : f32 to vector<128x128xf32>
    %10 = arith.maximumf %8, %9 : vector<128x128xf32>
    %11 = arith.truncf %10 : vector<128x128xf32> to vector<128x128xbf16>
    %c1 = arith.constant 1 : index
    %c0_9 = arith.constant 0 : index
    %c0_10 = arith.constant 0 : index
    %12 = vector.load %arg6[%c1, %c0_9, %c0_10] : memref<7x128x128xbf16, #tpu.memory_space<vmem>>, vector<1x128x128xbf16>
    %13 = vector.shape_cast %12 : vector<1x128x128xbf16> to vector<128x128xbf16>
    %cst_11 = arith.constant dense<0.000000e+00> : vector<128x128xf32>
    %14 = tpu.matmul %11, %13, %cst_11 {dimension_numbers = #tpu.dot_dimension_numbers<[1], [0], [0], [1], [0, 0, 1, 1], [], []>} : vector<128x128xbf16>, vector<128x128xbf16>, vector<128x128xf32> -> vector<128x128xf32>
    %c1_12 = arith.constant 1 : index
    %c0_13 = arith.constant 0 : index
    %c0_14 = arith.constant 0 : index
    %15 = vector.load %arg7[%c1_12, %c0_13, %c0_14] : memref<3x1x128xf32, #tpu.memory_space<vmem>>, vector<1x1x128xf32>
    %16 = vector.shape_cast %15 : vector<1x1x128xf32> to vector<1x128xf32>
    %17 = vector.broadcast %16 : vector<1x128xf32> to vector<128x128xf32>
    %18 = arith.addf %14, %17 : vector<128x128xf32>
    %cst_15 = arith.constant 0.000000e+00 : f32
    %19 = vector.broadcast %cst_15 : f32 to vector<128x128xf32>
    %20 = arith.maximumf %18, %19 : vector<128x128xf32>
    %21 = arith.truncf %20 : vector<128x128xf32> to vector<128x128xbf16>
    %c0_16 = arith.constant 0 : index
    %c0_17 = arith.constant 0 : index
    %c0_18 = arith.constant 0 : index
    %22 = vector.load %arg2[%c0_16, %c0_17, %c0_18] : memref<1x128x128xbf16, #tpu.memory_space<vmem>>, vector<1x128x128xbf16>
    %23 = vector.shape_cast %22 : vector<1x128x128xbf16> to vector<128x128xbf16>
    %c3 = arith.constant 3 : index
    %c0_19 = arith.constant 0 : index
    %c0_20 = arith.constant 0 : index
    %24 = vector.load %arg6[%c3, %c0_19, %c0_20] : memref<7x128x128xbf16, #tpu.memory_space<vmem>>, vector<1x128x128xbf16>
    %25 = vector.shape_cast %24 : vector<1x128x128xbf16> to vector<128x128xbf16>
    %c4 = arith.constant 4 : index
    %c0_21 = arith.constant 0 : index
    %c0_22 = arith.constant 0 : index
    %26 = vector.load %arg6[%c4, %c0_21, %c0_22] : memref<7x128x128xbf16, #tpu.memory_space<vmem>>, vector<1x128x128xbf16>
    %27 = vector.shape_cast %26 : vector<1x128x128xbf16> to vector<128x128xbf16>
    %cst_23 = arith.constant dense<0.000000e+00> : vector<128x128xf32>
    %28 = tpu.matmul %21, %27, %cst_23 {dimension_numbers = #tpu.dot_dimension_numbers<[1], [0], [0], [1], [0, 0, 1, 1], [], []>} : vector<128x128xbf16>, vector<128x128xbf16>, vector<128x128xf32> -> vector<128x128xf32>
    %29 = arith.truncf %28 : vector<128x128xf32> to vector<128x128xbf16>
    %cst_24 = arith.constant dense<0.000000e+00> : vector<128x128xf32>
    %30 = tpu.matmul %23, %29, %cst_24 {dimension_numbers = #tpu.dot_dimension_numbers<[1], [0], [0], [1], [0, 0, 1, 1], [], []>} : vector<128x128xbf16>, vector<128x128xbf16>, vector<128x128xf32> -> vector<128x128xf32>
    %cst_25 = arith.constant dense<0.000000e+00> : vector<128x128xf32>
    %31 = tpu.matmul %21, %25, %cst_25 {dimension_numbers = #tpu.dot_dimension_numbers<[1], [0], [0], [1], [0, 0, 1, 1], [], []>} : vector<128x128xbf16>, vector<128x128xbf16>, vector<128x128xf32> -> vector<128x128xf32>
    %32 = arith.addf %31, %30 : vector<128x128xf32>
    %c0_26 = arith.constant 0 : index
    %c0_27 = arith.constant 0 : index
    %c0_28 = arith.constant 0 : index
    %33 = vector.load %arg3[%c0_26, %c0_27, %c0_28] : memref<2x128x128xf32, #tpu.memory_space<vmem>>, vector<1x128x128xf32>
    %34 = vector.shape_cast %33 : vector<1x128x128xf32> to vector<128x128xf32>
    %35 = arith.addf %32, %34 : vector<128x128xf32>
    %cst_29 = arith.constant 0.000000e+00 : f32
    %36 = vector.broadcast %cst_29 : f32 to vector<128x128xf32>
    %37 = arith.maximumf %35, %36 : vector<128x128xf32>
    %38 = arith.truncf %37 : vector<128x128xf32> to vector<128x128xbf16>
    %c5 = arith.constant 5 : index
    %c0_30 = arith.constant 0 : index
    %c0_31 = arith.constant 0 : index
    %39 = vector.load %arg6[%c5, %c0_30, %c0_31] : memref<7x128x128xbf16, #tpu.memory_space<vmem>>, vector<1x128x128xbf16>
    %40 = vector.shape_cast %39 : vector<1x128x128xbf16> to vector<128x128xbf16>
    %c6 = arith.constant 6 : index
    %c0_32 = arith.constant 0 : index
    %c0_33 = arith.constant 0 : index
    %41 = vector.load %arg6[%c6, %c0_32, %c0_33] : memref<7x128x128xbf16, #tpu.memory_space<vmem>>, vector<1x128x128xbf16>
    %42 = vector.shape_cast %41 : vector<1x128x128xbf16> to vector<128x128xbf16>
    %cst_34 = arith.constant dense<0.000000e+00> : vector<128x128xf32>
    %43 = tpu.matmul %38, %42, %cst_34 {dimension_numbers = #tpu.dot_dimension_numbers<[1], [0], [0], [1], [0, 0, 1, 1], [], []>} : vector<128x128xbf16>, vector<128x128xbf16>, vector<128x128xf32> -> vector<128x128xf32>
    %44 = arith.truncf %43 : vector<128x128xf32> to vector<128x128xbf16>
    %cst_35 = arith.constant dense<0.000000e+00> : vector<128x128xf32>
    %45 = tpu.matmul %23, %44, %cst_35 {dimension_numbers = #tpu.dot_dimension_numbers<[1], [0], [0], [1], [0, 0, 1, 1], [], []>} : vector<128x128xbf16>, vector<128x128xbf16>, vector<128x128xf32> -> vector<128x128xf32>
    %cst_36 = arith.constant dense<0.000000e+00> : vector<128x128xf32>
    %46 = tpu.matmul %38, %40, %cst_36 {dimension_numbers = #tpu.dot_dimension_numbers<[1], [0], [0], [1], [0, 0, 1, 1], [], []>} : vector<128x128xbf16>, vector<128x128xbf16>, vector<128x128xf32> -> vector<128x128xf32>
    %47 = arith.addf %46, %45 : vector<128x128xf32>
    %c1_37 = arith.constant 1 : index
    %c0_38 = arith.constant 0 : index
    %c0_39 = arith.constant 0 : index
    %48 = vector.load %arg3[%c1_37, %c0_38, %c0_39] : memref<2x128x128xf32, #tpu.memory_space<vmem>>, vector<1x128x128xf32>
    %49 = vector.shape_cast %48 : vector<1x128x128xf32> to vector<128x128xf32>
    %50 = arith.addf %47, %49 : vector<128x128xf32>
    %cst_40 = arith.constant 0.000000e+00 : f32
    %51 = vector.broadcast %cst_40 : f32 to vector<128x128xf32>
    %52 = arith.maximumf %50, %51 : vector<128x128xf32>
    %53 = arith.truncf %52 : vector<128x128xf32> to vector<128x128xbf16>
    %c0_41 = arith.constant 0 : index
    %c0_42 = arith.constant 0 : index
    %c0_43 = arith.constant 0 : index
    %54 = vector.load %arg4[%c0_41, %c0_42, %c0_43] : memref<1x8x128xbf16, #tpu.memory_space<vmem>>, vector<1x8x128xbf16>
    %55 = vector.shape_cast %54 : vector<1x8x128xbf16> to vector<8x128xbf16>
    %cst_44 = arith.constant dense<0.000000e+00> : vector<8x128xf32>
    %56 = tpu.matmul %55, %53, %cst_44 {dimension_numbers = #tpu.dot_dimension_numbers<[1], [0], [0], [1], [0, 0, 1, 1], [], []>} : vector<8x128xbf16>, vector<128x128xbf16>, vector<8x128xf32> -> vector<8x128xf32>
    %c0_45 = arith.constant 0 : index
    %c0_46 = arith.constant 0 : index
    %c0_47 = arith.constant 0 : index
    %57 = vector.load %arg5[%c0_45, %c0_46, %c0_47] : memref<1x8x128xf32, #tpu.memory_space<vmem>>, vector<1x8x128xf32>
    %58 = vector.shape_cast %57 : vector<1x8x128xf32> to vector<8x128xf32>
    %59 = arith.mulf %56, %58 : vector<8x128xf32>
    %60 = arith.truncf %59 : vector<8x128xf32> to vector<8x128xbf16>
    %c2 = arith.constant 2 : index
    %c0_48 = arith.constant 0 : index
    %c0_49 = arith.constant 0 : index
    %61 = vector.load %arg6[%c2, %c0_48, %c0_49] : memref<7x128x128xbf16, #tpu.memory_space<vmem>>, vector<1x128x128xbf16>
    %62 = vector.shape_cast %61 : vector<1x128x128xbf16> to vector<128x128xbf16>
    %cst_50 = arith.constant dense<0.000000e+00> : vector<8x128xf32>
    %63 = tpu.matmul %60, %62, %cst_50 {dimension_numbers = #tpu.dot_dimension_numbers<[1], [0], [0], [1], [0, 0, 1, 1], [], []>} : vector<8x128xbf16>, vector<128x128xbf16>, vector<8x128xf32> -> vector<8x128xf32>
    %c2_51 = arith.constant 2 : index
    %c0_52 = arith.constant 0 : index
    %c0_53 = arith.constant 0 : index
    %64 = vector.load %arg7[%c2_51, %c0_52, %c0_53] : memref<3x1x128xf32, #tpu.memory_space<vmem>>, vector<1x1x128xf32>
    %65 = vector.shape_cast %64 : vector<1x1x128xf32> to vector<1x128xf32>
    %66 = vector.broadcast %65 : vector<1x128xf32> to vector<8x128xf32>
    %67 = arith.addf %63, %66 : vector<8x128xf32>
    %c0_54 = arith.constant 0 : index
    %c0_55 = arith.constant 0 : index
    %c0_56 = arith.constant 0 : index
    %68 = vector.load %arg8[%c0_54, %c0_55, %c0_56] : memref<1x8x128xf32, #tpu.memory_space<vmem>>, vector<1x8x128xf32>
    %69 = vector.shape_cast %68 : vector<1x8x128xf32> to vector<8x128xf32>
    %70 = vector.shape_cast %67 : vector<8x128xf32> to vector<1x8x128xf32>
    tpu.vector_store %arg8[%c0_54, %c0_55, %c0_56], %70 {strides = array<i32>} : memref<1x8x128xf32, #tpu.memory_space<vmem>>, vector<1x8x128xf32>,
    return
  }
  func.func @transform_0(%arg0: i32) -> (i32, i32, i32) {
    %c0_i32 = arith.constant 0 : i32
    %c0_i32_0 = arith.constant 0 : i32
    %c0_i32_1 = arith.constant 0 : i32
    return %arg0, %c0_i32, %c0_i32_0 : i32, i32, i32
  }
  func.func @transform_1(%arg0: i32) -> (i32, i32, i32) {
    %c0_i32 = arith.constant 0 : i32
    %c0_i32_0 = arith.constant 0 : i32
    %c0_i32_1 = arith.constant 0 : i32
    return %arg0, %c0_i32, %c0_i32_0 : i32, i32, i32
  }
  func.func @transform_2(%arg0: i32) -> (i32, i32, i32) {
    %c0_i32 = arith.constant 0 : i32
    %c0_i32_0 = arith.constant 0 : i32
    %c0_i32_1 = arith.constant 0 : i32
    return %arg0, %c0_i32, %c0_i32_0 : i32, i32, i32
  }
  func.func @transform_3(%arg0: i32) -> (i32, i32, i32) {
    %c0_i32 = arith.constant 0 : i32
    %c0_i32_0 = arith.constant 0 : i32
    %c0_i32_1 = arith.constant 0 : i32
    return %arg0, %c0_i32, %c0_i32_0 : i32, i32, i32
  }
  func.func @transform_4(%arg0: i32) -> (i32, i32, i32) {
    %c0_i32 = arith.constant 0 : i32
    %c0_i32_0 = arith.constant 0 : i32
    %c0_i32_1 = arith.constant 0 : i32
    return %arg0, %c0_i32, %c0_i32_0 : i32, i32, i32
  }
  func.func @transform_5(%arg0: i32) -> (i32, i32, i32) {
    %c0_i32 = arith.constant 0 : i32
    %c0_i32_0 = arith.constant 0 : i32
    %c0_i32_1 = arith.constant 0 : i32
    %c0_i32_2 = arith.constant 0 : i32
    return %c0_i32, %c0_i32_0, %c0_i32_1 : i32, i32, i32
  }
  func.func @transform_6(%arg0: i32) -> (i32, i32, i32) {
    %c0_i32 = arith.constant 0 : i32
    %c0_i32_0 = arith.constant 0 : i32
    %c0_i32_1 = arith.constant 0 : i32
    %c0_i32_2 = arith.constant 0 : i32
    return %c0_i32, %c0_i32_0, %c0_i32_1 : i32, i32, i32
  }
  func.func @transform_7(%arg0: i32) -> (i32, i32, i32) {
    %c0_i32 = arith.constant 0 : i32
    %c0_i32_0 = arith.constant 0 : i32
    %c0_i32_1 = arith.constant 0 : i32
    return %arg0, %c0_i32, %c0_i32_0 : i32, i32, i32
  }
}

</mosaic_0001>

<bundles_post_ra>
// kernel: tpu_custom_call.1
= control target key start
LH: loop header
LB: loop body
LE: loop exit
PB: predicated region body
PF: predicated region fallthrough
CT: control target
= control target key end

     0   :  { %s3803_s0 = inlined_call_operand.hbm [shape: bf16[2,128,128], index: 0, kind: input, shape index: {}]   ;;  %s3804_s1 = inlined_call_operand.hbm [shape: bf16[2,128,128], index: 1, kind: input, shape index: {}]   ;;  %s3805_s2 = inlined_call_operand.hbm [shape: f32[4,128,128], index: 2, kind: input, shape index: {}]   ;;  %s3806_s3 = inlined_call_operand.vmem [shape: bf16[2,8,128], index: 3, kind: input, shape index: {}]   ;;  %s3807_s4 = inlined_call_operand.hbm [shape: f32[2,8,128], index: 4, kind: input, shape index: {}]   ;;  %s3808_s5 = inlined_call_operand.hbm [shape: bf16[7,128,128], index: 5, kind: input, shape index: {}]   ;;  %s3809_s6 = inlined_call_operand.vmem [shape: f32[3,1,128], index: 6, kind: input, shape index: {}]   ;;  %s3810_s7 = inlined_call_operand.hbm [shape: f32[2,8,128], index: 7, kind: output, shape index: {}]  }
   0x1   :  { %3824 = sst [smem:[#allocation21_spill]] %s3804_s1 }
   0x2   :  { %3825 = sst [smem:[#allocation22_spill]] %s3808_s5 }
   0x3   :  { %12 = vsyncpa [#allocation3], 0 }
   0x4   :  { %14 = vsyncpa [#allocation3 + $0x1], 0 }
   0x5   :  { %15 = vsyncpa [#allocation6], 0 }
   0x6   :  { %17 = vsyncpa [#allocation6 + $0x1], 0 }
   0x7   :  { %18 = vsyncpa [#allocation9], 0 }
   0x8   :  { %20 = vsyncpa [#allocation9 + $0x1], 0 }
   0x9   :  { %21 = vsyncpa [#allocation4], 0 }
   0xa   :  { %23 = vsyncpa [#allocation4 + $0x1], 0  ;;  %s3288_s24 = smov 0   ;;  %s3290_s25 = smov 0  }
   0xb   :  { %s3292_s26 = smov 0   ;;  %s3294_s27 = smov 0  }
   0xc LB: > { %3826 = sst [smem:[#allocation17_spill]] %s3230_s26  ;;  %s3309_s28 = sadd.s32 4294967295, %s3234_s27   ;;  %s3234_s27 = sphi %s3294_s27, %s3856_s27   ;;  %s3230_s26 = sphi %s3292_s26, %s3858_s26   ;;  %s3226_s25 = sphi %s3290_s25, %s3860_s25   ;;  %s3222_s24 = sphi %s3288_s24, %s3859_s24  }
   0xd   : > { %s2259_s29 = sadd.s32 4294967294, %s3234_s27   ;;  %s3313_s30 = sadd.s32 1, %s3234_s27  }
   0xe   : > { %3827 = sst [smem:[#allocation18_spill]] %s3313_s30  ;;  %s36_s8 = sadd.s32 1, %s3230_s26 }
   0xf   : > { %s33_s9 = ssub.s32 %s3234_s27, %s3313_s30  ;;  %p43_p0 = scmp.ne.s32.totalorder %s3230_s26, %s3226_s25 }
  0x10   : > { %p34_p1 = scmp.eq.s32.totalorder %s33_s9, 0  ;;  %p44_p2 = scmp.eq.s32.totalorder %s3234_s27, 0 }
  0x11   : > { %p49_p3 = scmp.ne.s32.totalorder %s3226_s25, %s3222_s24  ;;  %p3811_p4 = scmp.eq.s32.totalorder %s3309_s28, 0 }
  0x12   : > { %s3325_s10 = scalar_select %p34_p1, %s3230_s26, %s36_s8  }
  0x13   : > { %p3327_p5 = por %p44_p2, %p43_p0  ;;  %p3333_p6 = por %p3811_p4, %p49_p3 }
  0x14   : > { %3828 = sst [smem:[#allocation19_spill]] %s3325_s10  ;;  %p219_p7 = scmp.eq.s32.totalorder %s3309_s28, 1 }
  0x15   : > { %s3829_s11 = scalar_select %p3327_p5, 1, 0 }
  0x16   : > { %s3830_s12 = scalar_select %p3333_p6, 1, 0 }
  0x17   : > { %p225_p8 = scmp.eq.s32.totalorder %s2259_s29, 1  ;;  %p2260_p9 = scmp.ge.s32.totalorder %s3234_s27, 1 }
  0x18   : > { %p232_p10 = scmp.lt.s32.totalorder %s3234_s27, 3  ;;  %p3340_p11 = por %p219_p7, %p43_p0 }
  0x19   : > { %p3344_p12 = por %p225_p8, %p49_p3  ;;  %s3236_s16 = smov [#allocation10]  }
  0x1a   : > { %s3831_s13 = scalar_select %p3340_p11, 1, 0 }
  0x1b   : > { %s3832_s14 = scalar_select %p3344_p12, 1, 0 }
  0x1c   : > { %p3348_p13 = pnand %p2260_p9, %p232_p10  ;;  %s244_s17 = sshll.u32 %s3236_s16, 4  ;;  %s245_s17 = int_to_ptr.vmem [resolvable:$true] %s244_s17 }
  0x1d   : > { %3833 = sst [smem:[#allocation20_spill]] %s3832_s14  ;;  %s3363_s19 = sand.u32 1, %s3230_s26  }
  0x1e   : > { %s3834_s15 = scalar_select %p3348_p13, 1, 0 }
  0x1f   : > { %p2872_p1 = pneg %p3348_p13  ;;  %s3836_s5 = sld [smem:[#allocation22_spill]] }
  0x21   : > { %p3356_p2 = pnand %p2872_p1, %p3811_p4 }
  0x23   : > { %p3010_p8 = pneg %p3356_p2 }
  0x25   : > { %s3008_s23 = scalar_lea.hbm %s3836_s5, 7168 }
  0x26   : > { %p3009_p7 = scmp.ne.s32.totalorder %s3836_s5, %s3008_s23  ;;  %p3015_p1 = scmp.lt.u32.totalorder %s3008_s23, %s3836_s5 }
  0x28   : > { %p3011_p9 = pnand %p3010_p8, %p3009_p7 }
  0x2a   : > { %p3012_p10 = pneg %p3011_p9 }
  0x2c   : > { %p3017_p0 = pnand %p3015_p1, %p3012_p10 }
  0x2e   : > { %3020 = shalt.err (!%p3017_p0)
}
  0x2f   : > { %s3021_s10 = scalar_lea.vmem %s245_s17, 7168  ;;  %p3029_p11 = scmp.lt.s32.totalorder %s245_s17, %s245_s17 }
  0x30   : > { %p3022_p4 = scmp.ne.s32.totalorder %s245_s17, %s3021_s10  ;;  %p3030_p6 = scmp.lt.s32.totalorder %s3021_s10, %s3021_s10 }
  0x32   : > { %p3024_p3 = pnand %p3022_p4, %p3010_p8  ;;  %p3031_p13 = por %p3030_p6, %p3029_p11 }
  0x34   : > { %p3025_p12 = pneg %p3024_p3 }
  0x36   : > { %p3032_p5 = pnand %p3031_p13, %p3025_p12 }
  0x38   : > { %3035 = shalt.err (!%p3032_p5)
}
  0x39   : > { %s3816_s21 = smov 64   ;;  %s3238_s22 = smov 4  }
  0x3a   : > { %2875 = dma.hbm_to_vmem [thread:$0]  (!%p3356_p2), %s3836_s5, 7168, %s245_s17, [#allocation9], %s3816_s21, %s3816_s21, %s3238_s22  }
  0x3b   : > { %s3818_s10 = sshll.u32 %s3234_s27, 10  ;;  %p3837_p4 = scmp.ne.s32.totalorder %s3829_s11, 0 }
  0x3c   : > { %p3838_p5 = scmp.lt.s32.totalorder %s3234_s27, 2  ;;  %s3819_s9 = sand.u32 1, %s3234_s27  }
  0x3d   : > { %s3840_s1 = sld [smem:[#allocation21_spill]]  ;;  %s3841_s26 = sshll.u32 %s3363_s19, 6 }
  0x3e   : > { %p3390_p6 = pnand %p3838_p5, %p3837_p4  ;;  %s286_s17 = scalar_lea.vmem [#allocation5], %s3841_s26 }
  0x3f   : > { %s293_s11 = sshll.u32 %s286_s17, 4  ;;  %s3408_s23 = scalar_lea.sflag [#allocation6], %s3819_s9  ;;  %s3404_s11 = int_to_ptr.vmem [resolvable:$true] %s293_s11 }
  0x40   : > { %s3839_s8 = scalar_select %p3390_p6, 1, 0 }
  0x41   : > { %p3414_p12 = pneg %p3390_p6 }
  0x43   : > { %s3400_s18 = scalar_lea.hbm %s3840_s1, %s3818_s10  ;;  %s3041_s26 = scalar_lea.hbm %s3840_s1, 2048 }
  0x44   : > { %s3036_s29 = scalar_lea.hbm %s3400_s18, 1024  ;;  %p3042_p0 = scmp.lt.u32.totalorder %s3400_s18, %s3840_s1 }
  0x45   : > { %p3037_p11 = scmp.ne.s32.totalorder %s3400_s18, %s3036_s29  ;;  %p3043_p3 = scmp.lt.u32.totalorder %s3041_s26, %s3036_s29 }
  0x46   : > { %p3045_p8 = scmp.lt.u32.totalorder %s3036_s29, %s3400_s18 }
  0x47   : > { %p3039_p13 = pnand %p3414_p12, %p3037_p11  ;;  %p3044_p7 = por %p3043_p3, %p3042_p0 }
  0x49   : > { %p3040_p2 = pneg %p3039_p13  ;;  %p3046_p9 = por %p3045_p8, %p3044_p7 }
  0x4b   : > { %p3047_p10 = pnand %p3046_p9, %p3040_p2 }
  0x4d   : > { %3050 = shalt.err (!%p3047_p10)
}
  0x4e   : > { %s3051_s9 = scalar_lea.vmem %s3404_s11, 1024  ;;  %s3239_s20 = smov [#allocation5]  }
  0x4f   : > { %p3052_p1 = scmp.ne.s32.totalorder %s3404_s11, %s3051_s9  ;;  %s3056_s16 = sshll.u32 %s3239_s20, 4  ;;  %s3057_s16 = int_to_ptr.vmem [resolvable:$false] %s3056_s16 }
  0x50   : > { %s3058_s10 = scalar_lea.vmem %s3057_s16, 2048  ;;  %p3059_p11 = scmp.lt.s32.totalorder %s3404_s11, %s3057_s16 }
  0x51   : > { %p3054_p4 = pnand %p3052_p1, %p3414_p12  ;;  %p3060_p13 = scmp.lt.s32.totalorder %s3058_s10, %s3051_s9 }
  0x53   : > { %p3055_p5 = pneg %p3054_p4  ;;  %p3061_p0 = por %p3060_p13, %p3059_p11 }
  0x55   : > { %p3062_p3 = pnand %p3061_p0, %p3055_p5 }
  0x57   : > { %3065 = shalt.err (!%p3062_p3)
}
  0x58   : > { %s3843_s29 = smov 64   ;;  %s3844_s26 = sshll.u32 %s3234_s27, 10 }
  0x59   : > { %2882 = dma.hbm_to_vmem [thread:$0]  (!%p3390_p6), %s3400_s18, 1024, %s3404_s11, %s3408_s23, %s3843_s29, %s3843_s29, %s3238_s22  }
  0x5a   : > { %s3446_s20 = scalar_lea.hbm %s3803_s0, %s3844_s26  ;;  %s3845_s16 = sshll.u32 %s3363_s19, 6 }
  0x5b   : > { %s265_s10 = scalar_lea.vmem [#allocation2], %s3845_s16  ;;  %s2269_s5 = sshll.u32 %s3363_s19, 8 }
  0x5c   : > { %s272_s1 = sshll.u32 %s265_s10, 4  ;;  %s262_s30 = scalar_lea.sflag [#allocation3], %s3363_s19  ;;  %s3451_s1 = int_to_ptr.vmem [resolvable:$true] %s272_s1 }
  0x5d   : > { %s3066_s14 = scalar_lea.hbm %s3446_s20, 1024  ;;  %s3071_s26 = scalar_lea.hbm %s3803_s0, 2048 }
  0x5e   : > { %p3067_p2 = scmp.ne.s32.totalorder %s3446_s20, %s3066_s14  ;;  %p3072_p9 = scmp.lt.u32.totalorder %s3446_s20, %s3803_s0 }
  0x5f   : > { %p3073_p10 = scmp.lt.u32.totalorder %s3071_s26, %s3066_s14  ;;  %p3075_p4 = scmp.lt.u32.totalorder %s3066_s14, %s3446_s20 }
  0x60   : > { %p3069_p7 = pnand %p3067_p2, %p3414_p12 }
  0x61   : > { %p3074_p1 = por %p3073_p10, %p3072_p9 }
  0x62   : > { %p3070_p8 = pneg %p3069_p7 }
  0x63   : > { %p3076_p5 = por %p3075_p4, %p3074_p1 }
  0x65   : > { %p3077_p11 = pnand %p3076_p5, %p3070_p8 }
  0x67   : > { %3080 = shalt.err (!%p3077_p11)
}
  0x68   : > { %s3081_s16 = scalar_lea.vmem %s3451_s1, 1024  ;;  %s3240_s10 = smov [#allocation2]  }
  0x69   : > { %p3082_p13 = scmp.ne.s32.totalorder %s3451_s1, %s3081_s16  ;;  %s3086_s18 = sshll.u32 %s3240_s10, 4  ;;  %s3087_s18 = int_to_ptr.vmem [resolvable:$false] %s3086_s18 }
  0x6a   : > { %s3088_s11 = scalar_lea.vmem %s3087_s18, 2048  ;;  %p3089_p2 = scmp.lt.s32.totalorder %s3451_s1, %s3087_s18 }
  0x6b   : > { %p3084_p0 = pnand %p3082_p13, %p3414_p12  ;;  %p3090_p7 = scmp.lt.s32.totalorder %s3088_s11, %s3081_s16 }
  0x6d   : > { %p3085_p3 = pneg %p3084_p0  ;;  %p3091_p9 = por %p3090_p7, %p3089_p2 }
  0x6f   : > { %p3092_p10 = pnand %p3091_p9, %p3085_p3 }
  0x71   : > { %3095 = shalt.err (!%p3092_p10)
}
  0x72   : > { %2879 = dma.hbm_to_vmem [thread:$0]  (!%p3390_p6), %s3446_s20, 1024, %s3451_s1, %s262_s30, %s3843_s29, %s3843_s29, %s3238_s22  }
  0x73   : > { %s2383_s14 = sshll.u32 %s3234_s27, 12  ;;  %s307_s26 = scalar_lea.vmem [#allocation7], %s2269_s5 }
  0x74   : > { %s315_s17 = sshll.u32 %s307_s26, 4  ;;  %s3486_s10 = scalar_lea.hbm %s3805_s2, %s2383_s14  ;;  %s3488_s17 = int_to_ptr.vmem [resolvable:$true] %s315_s17 }
  0x75   : > { %s3096_s18 = scalar_lea.hbm %s3486_s10, 4096  ;;  %s3101_s5 = scalar_lea.hbm %s3805_s2, 8192 }
  0x76   : > { %p3097_p8 = scmp.ne.s32.totalorder %s3486_s10, %s3096_s18  ;;  %p3102_p5 = scmp.lt.u32.totalorder %s3486_s10, %s3805_s2 }
  0x77   : > { %p3103_p11 = scmp.lt.u32.totalorder %s3101_s5, %s3096_s18  ;;  %p3105_p0 = scmp.lt.u32.totalorder %s3096_s18, %s3486_s10 }
  0x78   : > { %p3099_p1 = pnand %p3097_p8, %p3414_p12 }
  0x79   : > { %p3104_p13 = por %p3103_p11, %p3102_p5 }
  0x7a   : > { %p3100_p4 = pneg %p3099_p1 }
  0x7b   : > { %p3106_p3 = por %p3105_p0, %p3104_p13 }
  0x7d   : > { %p3107_p2 = pnand %p3106_p3, %p3100_p4 }
  0x7f   : > { %3110 = shalt.err (!%p3107_p2)
}
  0x80   : > { %s3111_s20 = scalar_lea.vmem %s3488_s17, 4096  ;;  %s3241_s11 = smov [#allocation7]  }
  0x81   : > { %p3112_p7 = scmp.ne.s32.totalorder %s3488_s17, %s3111_s20  ;;  %s3116_s14 = sshll.u32 %s3241_s11, 4  ;;  %s3117_s14 = int_to_ptr.vmem [resolvable:$false] %s3116_s14 }
  0x82   : > { %s3118_s26 = scalar_lea.vmem %s3117_s14, 8192  ;;  %p3119_p8 = scmp.lt.s32.totalorder %s3488_s17, %s3117_s14 }
  0x83   : > { %p3114_p9 = pnand %p3112_p7, %p3414_p12  ;;  %p3120_p1 = scmp.lt.s32.totalorder %s3118_s26, %s3111_s20 }
  0x85   : > { %p3115_p10 = pneg %p3114_p9  ;;  %p3121_p5 = por %p3120_p1, %p3119_p8 }
  0x87   : > { %p3122_p11 = pnand %p3121_p5, %p3115_p10 }
  0x89   : > { %3125 = shalt.err (!%p3122_p11)
}
  0x8a   : > { %s3242_s9 = smov 128   ;;  %s3243_s16 = smov 8  }
  0x8b   : > { %2885 = dma.hbm_to_vmem [thread:$0]  (!%p3390_p6), %s3486_s10, 4096, %s3488_s17, %s3408_s23, %s3242_s9, %s3242_s9, %s3243_s16  }
  0x8c   : > { %s2273_s18 = sshll.u32 %s3363_s19, 3  ;;  %s2274_s1 = sshll.u32 %s3234_s27, 7 }
  0x8d   : > { %s3517_s22 = scalar_lea.hbm %s3807_s4, %s2274_s1  ;;  %s336_s29 = scalar_lea.vmem [#allocation8], %s2273_s18 }
  0x8e   : > { %s343_s20 = sshll.u32 %s336_s29, 4  ;;  %s3846_s11 = sand.u32 1, %s3234_s27   ;;  %s344_s20 = int_to_ptr.vmem [resolvable:$true] %s343_s20 }
  0x8f   : > { %s333_s14 = scalar_lea.sflag [#allocation9], %s3846_s11  ;;  %s3126_s26 = scalar_lea.hbm %s3517_s22, 128 }
  0x90   : > { %p3127_p4 = scmp.ne.s32.totalorder %s3517_s22, %s3126_s26  ;;  %s3131_s17 = scalar_lea.hbm %s3807_s4, 256 }
  0x91   : > { %p3132_p3 = scmp.lt.u32.totalorder %s3517_s22, %s3807_s4  ;;  %p3133_p2 = scmp.lt.u32.totalorder %s3131_s17, %s3126_s26 }
  0x92   : > { %p3129_p13 = pnand %p3127_p4, %p3414_p12  ;;  %p3135_p9 = scmp.lt.u32.totalorder %s3126_s26, %s3517_s22 }
  0x93   : > { %p3134_p7 = por %p3133_p2, %p3132_p3 }
  0x94   : > { %p3130_p0 = pneg %p3129_p13 }
  0x95   : > { %p3136_p10 = por %p3135_p9, %p3134_p7 }
  0x97   : > { %p3137_p8 = pnand %p3136_p10, %p3130_p0 }
  0x99   : > { %3140 = shalt.err (!%p3137_p8)
}
  0x9a   : > { %s3141_s16 = scalar_lea.vmem %s344_s20, 128  ;;  %s3244_s18 = smov [#allocation8]  }
  0x9b   : > { %p3142_p1 = scmp.ne.s32.totalorder %s344_s20, %s3141_s16  ;;  %s3146_s1 = sshll.u32 %s3244_s18, 4  ;;  %s3147_s1 = int_to_ptr.vmem [resolvable:$false] %s3146_s1 }
  0x9c   : > { %s3148_s30 = scalar_lea.vmem %s3147_s1, 256  ;;  %p3149_p4 = scmp.lt.s32.totalorder %s344_s20, %s3147_s1 }
  0x9d   : > { %p3144_p5 = pnand %p3142_p1, %p3414_p12  ;;  %p3150_p13 = scmp.lt.s32.totalorder %s3148_s30, %s3141_s16 }
  0x9f   : > { %p3145_p11 = pneg %p3144_p5  ;;  %p3151_p6 = por %p3150_p13, %p3149_p4 }
  0xa1   : > { %p3152_p2 = pnand %p3151_p6, %p3145_p11 }
  0xa3   : > { %3155 = shalt.err (!%p3152_p2)
}
  0xa4   : > { %p3847_p3 = scmp.ne.s32.totalorder %s3839_s8, 0  ;;  %p3848_p0 = scmp.ne.s32.totalorder %s3834_s15, 0 }
  0xa5   : > { %s3541_s21 = sand.u32 (!%p3848_p0), 1, %s3226_s25   ;;  %p3849_p12 = scmp.ne.s32.totalorder (!%p3848_p0), %s3830_s12, 0 }
  0xa6   : > { %2888 = dma.hbm_to_vmem [thread:$0]  (!%p3847_p3), %s3517_s22, 128, %s344_s20, %s333_s14  }
  0xa7   : > { %352 = sbr.rel (%p3848_p0) target bundleno = 2142 (0x85e), region = 48  ;;  %s2276_s5 = sshll.u32 (!%p3848_p0), %s3541_s21, 6 }
  0xa8   : > { %s355_s29 = scalar_lea.sflag (!%p3848_p0), [#allocation3], %s3541_s21  ;;  %s3545_s11 = scalar_lea.vmem (!%p3848_p0), [#allocation2], %s2276_s5 }
  0xae   : > { %3201 = dma.done.wait (%p3849_p12), %s355_s29, 1024  }
  0xaf   : > { %3203 = vsyncadd (%p3849_p12), %s355_s29, 4294966272  ;;  %s363_s8 = sand.u32 1, %s3309_s28   ;;  %s3552_s22 = scalar_lea.vmem [#allocation5], %s2276_s5 }
  0xb0   : > { %s364_s15 = scalar_lea.sflag [#allocation6], %s363_s8 }
  0xb1   : > { %3205 = dma.done.wait (%p3849_p12), %s364_s15, 5120  }
  0xb2   : > { %3207 = vsyncadd (%p3849_p12), %s364_s15, 4294962176  ;;  %s2278_s20 = sshll.u32 %s3541_s21, 8  ;;  %s2279_s14 = sshll.u32 %s3541_s21, 3 }
  0xb3   : > { %s3560_s26 = scalar_lea.vmem [#allocation7], %s2278_s20  ;;  %s382_s19 = scalar_lea.sflag [#allocation9], %s363_s8 }
  0xb4   : > { %s3564_s23 = scalar_lea.vmem [#allocation8], %s2279_s14 }
  0xb5   : > { %3209 = dma.done.wait (%p3849_p12), %s382_s19, 128  }
  0xb6   : > { %3211 = vsyncadd (%p3849_p12), %s382_s19, 4294967168  ;;  %p3850_p6 = scmp.eq.s32.totalorder %s3309_s28, 0 }
  0xb8   : > { %3213 = dma.done.wait (%p3850_p6), [#allocation9], 7168   ;;  %p3851_p7 = pmov %p3850_p6 }
  0xb9   : > { %v2936_v0 = vld [vmem:[#allocation10] sm:$0xff]   ;;  %v2937_v1 = vld [vmem:[#allocation10 + $0x8] sm:$0xff]   ;;  %v2938_v2 = vld [vmem:[#allocation10 + $0x10] sm:$0xff]   ;;  %vm3246_vm0 = vmmov 0   ;;  %p440_p9 = scmp.lt.s32.totalorder %s3309_s28, 1  ;;  %s2377_s8 = sshll.u32 %s3309_s28, 7 }
  0xba   : > { %3215 = vsyncadd (%p3851_p7), [#allocation9], 4294960128  ;;  %2530 = vmatprep.subr.bf16.mxu0 %v2936_v0  ;;  %v2939_v3 = vld [vmem:[#allocation10 + $0x18] sm:$0xff]   ;;  %v2944_v4 = vld [vmem:[%s3545_s11] sm:$0xff]   ;;  %s438_s15 = scalar_lea.vmem [#allocation11], %s2279_s14  ;;  %s3759_s19 = scalar_lea.hbm %s3810_s7, %s2377_s8 }
  0xbb   : > { %2531 = vmatpush3.bf16.msra.mxu0 %v2936_v0  ;;  %2546 = vmatprep.mubr.bf16.mxu0 %v2944_v4  ;;  %v2940_v5 = vld [vmem:[#allocation10 + $0x20] sm:$0xff]   ;;  %v2941_v6 = vld [vmem:[#allocation10 + $0x28] sm:$0xff]   ;;  %v2942_v9 = vld [vmem:[#allocation10 + $0x30] sm:$0xff]   ;;  %s441_s16 = scalar_select %p440_p9, %s3309_s28, 1 }
  0xbc   : > { %2532 = vmatprep.subr.bf16.mxu0 %v2937_v1  ;;  %v2952_v7 = vld [vmem:[#allocation10 + $0x40] sm:$0xff]   ;;  %v2953_v8 = vld [vmem:[#allocation10 + $0x48] sm:$0xff]   ;;  %v2954_v10 = vld [vmem:[#allocation10 + $0x50] sm:$0xff]   ;;  %s2089_s28 = scalar_lea.sflag [#allocation4], %s3541_s21  ;;  %p3852_p8 = scmp.ne.s32.totalorder %s3831_s13, 0 }
  0xbd   : > { %2562 = vmatprep.subr.bf16.mxu1 %v2952_v7  ;;  %v2943_v11 = vld [vmem:[#allocation10 + $0x38] sm:$0xff]   ;;  %v2956_v13 = vld [vmem:[#allocation10 + $0x60] sm:$0xff]   ;;  %v2957_v16 = vld [vmem:[#allocation10 + $0x68] sm:$0xff]   ;;  %s2282_s18 = sshll.u32 %s441_s16, 2  ;;  %s3247_s14 = smov [#allocation11]  }
  0xbe   : > { %2563 = vmatpush3.bf16.msra.mxu1 %v2952_v7  ;;  %v2955_v12 = vld [vmem:[#allocation10 + $0x58] sm:$0xff]   ;;  %v2946_v15 = vld [vmem:[%s3545_s11 + $0x10] sm:$0xff]   ;;  %v2947_v17 = vld [vmem:[%s3545_s11 + $0x18] sm:$0xff]   ;;  %s443_s5 = scalar_lea.vmem %s3806_s3, %s2282_s18  ;;  %s3160_s12 = sshll.u32 %s3247_s14, 4  ;;  %s3161_s12 = int_to_ptr.vmem [resolvable:$false] %s3160_s12 }
  0xbf   : > { %2533 = vmatpush3.bf16.msra.mxu0 %v2937_v1  ;;  %2564 = vmatprep.subr.bf16.mxu1 %v2953_v8  ;;  %v2945_v14 = vld [vmem:[%s3545_s11 + $0x8] sm:$0xff]   ;;  %v2948_v18 = vld [vmem:[%s3545_s11 + $0x20] sm:$0xff]   ;;  %v2950_v20 = vld [vmem:[%s3545_s11 + $0x30] sm:$0xff]   ;;  %s3162_s17 = scalar_lea.vmem %s3161_s12, 256 }
  0xc0   : > { %2534 = vmatprep.subr.bf16.mxu0 %v2938_v2  ;;  %v2949_v19 = vld [vmem:[%s3545_s11 + $0x28] sm:$0xff]   ;;  %v2951_v21 = vld [vmem:[%s3545_s11 + $0x38] sm:$0xff]   ;;  %v2958_v22 = vld [vmem:[#allocation10 + $0x70] sm:$0xff]  }
  0xc1   : > { %v2959_v23 = vld [vmem:[#allocation10 + $0x78] sm:$0xff]   ;;  %v2960_v24 = vld [vmem:[#allocation10 + $0x100] sm:$0xff]   ;;  %v2961_v25 = vld [vmem:[#allocation10 + $0x108] sm:$0xff]  }
  0xc2   : > { %2565 = vmatpush3.bf16.msra.mxu1 %v2953_v8  ;;  %v2962_v26 = vld [vmem:[#allocation10 + $0x110] sm:$0xff]   ;;  %v2963_v27 = vld [vmem:[#allocation10 + $0x118] sm:$0xff]   ;;  %v2964_v28 = vld [vmem:[#allocation10 + $0x120] sm:$0xff]  }
  0xc3   : > { %2535 = vmatpush3.bf16.msra.mxu0 %v2938_v2  ;;  %2566 = vmatprep.subr.bf16.mxu1 %v2954_v10  ;;  %v2965_v29 = vld [vmem:[#allocation10 + $0x128] sm:$0xff]   ;;  %v2283_v30 = vld [vmem:[%s3809_s6] ss:$0 sm:$0xff] }
  0xc4   : > { %2536 = vmatprep.subr.bf16.mxu0 %v2939_v3 }
  0xc6   : > { %2567 = vmatpush3.bf16.msra.mxu1 %v2954_v10 }
  0xc7   : > { %2537 = vmatpush3.bf16.msra.mxu0 %v2939_v3  ;;  %2568 = vmatprep.subr.bf16.mxu1 %v2955_v12 }
  0xc8   : > { %2538 = vmatprep.subr.bf16.mxu0 %v2940_v5 }
  0xca   : > { %2569 = vmatpush3.bf16.msra.mxu1 %v2955_v12 }
  0xcb   : > { %2539 = vmatpush3.bf16.msra.mxu0 %v2940_v5  ;;  %2570 = vmatprep.subr.bf16.mxu1 %v2956_v13 }
  0xcc   : > { %2540 = vmatprep.subr.bf16.mxu0 %v2941_v6 }
  0xce   : > { %2571 = vmatpush3.bf16.msra.mxu1 %v2956_v13 }
  0xcf   : > { %2541 = vmatpush3.bf16.msra.mxu0 %v2941_v6  ;;  %2572 = vmatprep.subr.bf16.mxu1 %v2957_v16 }
  0xd0   : > { %2542 = vmatprep.subr.bf16.mxu0 %v2942_v9 }
  0xd2   : > { %2573 = vmatpush3.bf16.msra.mxu1 %v2957_v16 }
  0xd3   : > { %2543 = vmatpush3.bf16.msra.mxu0 %v2942_v9  ;;  %2574 = vmatprep.subr.bf16.mxu1 %v2958_v22 }
  0xd4   : > { %2544 = vmatprep.subr.bf16.mxu0 %v2943_v11 }
  0xd6   : > { %2575 = vmatpush3.bf16.msra.mxu1 %v2958_v22 }
  0xd7   : > { %2545 = vmatpush3.bf16.msra.mxu0 %v2943_v11  ;;  %2576 = vmatprep.subr.bf16.mxu1 %v2959_v23 }
  0xd8   : > { %2594 = vmatprep.subr.bf16.mxu0 %v2960_v24 }
  0xda   : > { %2547 = vmatmul.mubr.bf16.vlgmr.msra.gmra.mrb[0].mxu0 %v2945_v14  ;;  %2577 = vmatpush3.bf16.msra.mxu1 %v2959_v23  ;;  %v2966_v23 = vld [vmem:[#allocation10 + $0x130] sm:$0xff]  }
  0xdb   : > { %2550 = vmatprep.mubr.bf16.mxu0 %v2946_v15  ;;  %2595 = vmatpush3.bf16.msra.mxu0 %v2960_v24  ;;  %v2967_v24 = vld [vmem:[#allocation10 + $0x138] sm:$0xff]  }
  0xdc   : > { %2596 = vmatprep.subr.bf16.mxu0 %v2961_v25 }
  0xdf   : > { %2597 = vmatpush3.bf16.msra.mxu0 %v2961_v25  ;;  %v2301_v25 = vld [vmem:[%s3809_s6 + $0x1] ss:$0 sm:$0xff] }
  0xe0   : > { %2598 = vmatprep.subr.bf16.mxu0 %v2962_v26 }
  0xe2   : > { %2551 = vmatmul.mubr.bf16.gmra.mrb[4].mxu0 %v2947_v17 }
  0xe3   : > { %2554 = vmatprep.mubr.bf16.mxu0 %v2948_v18  ;;  %2599 = vmatpush3.bf16.msra.mxu0 %v2962_v26 }
  0xe4   : > { %2600 = vmatprep.subr.bf16.mxu0 %v2963_v27 }
  0xe7   : > { %2601 = vmatpush3.bf16.msra.mxu0 %v2963_v27 }
  0xe8   : > { %2602 = vmatprep.subr.bf16.mxu0 %v2964_v28 }
  0xea   : > { %2555 = vmatmul.mubr.bf16.gmra.mrb[8].mxu0 %v2949_v19 }
  0xeb   : > { %2558 = vmatprep.mubr.bf16.mxu0 %v2950_v20  ;;  %2603 = vmatpush3.bf16.msra.mxu0 %v2964_v28 }
  0xec   : > { %2604 = vmatprep.subr.bf16.mxu0 %v2965_v29 }
  0xef   : > { %2605 = vmatpush3.bf16.msra.mxu0 %v2965_v29 }
  0xf0   : > { %2606 = vmatprep.subr.bf16.mxu0 %v2966_v23 }
  0xf2   : > { %2559 = vmatmul.mubr.bf16.gmra.mrb[12].mxu0 %v2951_v21 }
  0xf3   : > { %2607 = vmatpush3.bf16.msra.mxu0 %v2966_v23  ;;  %v2988_v23 = vld [vmem:[#allocation10 + $0x1a0] sm:$0xff]  }
  0xf4   : > { %2608 = vmatprep.subr.bf16.mxu0 %v2967_v24 }
  0xf7   : > { %2609 = vmatpush3.bf16.msra.mxu0 %v2967_v24  ;;  %v2989_v24 = vld [vmem:[#allocation10 + $0x1a8] sm:$0xff]  }
 0x1ad   : > { %v2548_v31 = vpop.f32.mrb[0].mxu0 }
 0x1ae   : > { %v623_v32 = vadd.f32 %v2548_v31, %v2283_v30  ;;  %v614_v33 = vpop.f32.mrb[1].mxu0 }
 0x1af   : > { %v615_v34 = vadd.f32 %v2283_v30, %v614_v33  ;;  %v2549_v35 = vpop.f32.mrb[2].mxu0 }
 0x1b0   : > { %v626_v36 = vadd.f32 %v2549_v35, %v2283_v30  ;;  %v617_v37 = vpop.f32.mrb[3].mxu0  ;;  %v679_v39 = vmax.f32 %v623_v32, 0.0 }
 0x1b1   : > { %v618_v38 = vadd.f32 %v2283_v30, %v617_v37  ;;  %v677_v41 = vmax.f32 %v615_v34, 0.0 }
 0x1b2   : > { %v680_v40 = vmax.f32 %v626_v36, 0.0 }
 0x1b3   : > { %v678_v42 = vmax.f32 %v618_v38, 0.0 }
 0x1b4   : > { %v694_v43 = vpack.c.bf16 %v680_v40, %v679_v39 }
 0x1b5   : > { %v2552_v44 = vpop.f32.mrb[4].mxu0  ;;  %v693_v45 = vpack.c.bf16 %v678_v42, %v677_v41 }
 0x1b6   : > { %v639_v46 = vadd.f32 %v2552_v44, %v2283_v30  ;;  %v630_v47 = vpop.f32.mrb[5].mxu0 }
 0x1b7   : > { %v631_v48 = vadd.f32 %v2283_v30, %v630_v47  ;;  %v2553_v49 = vpop.f32.mrb[6].mxu0  ;;  %2578 = vmatprep.mubr.bf16.mxu1 %v693_v45 }
 0x1b8   : > { %v642_v50 = vadd.f32 %v2553_v49, %v2283_v30  ;;  %v633_v51 = vpop.f32.mrb[7].mxu0  ;;  %2579 = vmatmul.mubr.bf16.vlgmr.msra.gmra.mrb[0].mxu1 %v694_v43  ;;  %v683_v53 = vmax.f32 %v639_v46, 0.0 }
 0x1b9   : > { %v634_v52 = vadd.f32 %v2283_v30, %v633_v51  ;;  %v681_v55 = vmax.f32 %v631_v48, 0.0 }
 0x1ba   : > { %v684_v54 = vmax.f32 %v642_v50, 0.0 }
 0x1bb   : > { %v682_v56 = vmax.f32 %v634_v52, 0.0 }
 0x1bc   : > { %v696_v57 = vpack.c.bf16 %v684_v54, %v683_v53 }
 0x1bd   : > { %v695_v58 = vpack.c.bf16 %v682_v56, %v681_v55  ;;  %v2556_v59 = vpop.f32.mrb[8].mxu0 }
 0x1be   : > { %v655_v60 = vadd.f32 %v2556_v59, %v2283_v30  ;;  %v646_v61 = vpop.f32.mrb[9].mxu0 }
 0x1bf   : > { %v647_v62 = vadd.f32 %v2283_v30, %v646_v61  ;;  %v2557_v63 = vpop.f32.mrb[10].mxu0  ;;  %2582 = vmatprep.mubr.bf16.mxu1 %v695_v58 }
 0x1c0   : > { %v658_v0 = vadd.f32 %v2557_v63, %v2283_v30  ;;  %v649_v1 = vpop.f32.mrb[11].mxu0  ;;  %2583 = vmatmul.mubr.bf16.gmra.mrb[4].mxu1 %v696_v57  ;;  %v687_v3 = vmax.f32 %v655_v60, 0.0 }
 0x1c1   : > { %v650_v2 = vadd.f32 %v2283_v30, %v649_v1  ;;  %v685_v5 = vmax.f32 %v647_v62, 0.0 }
 0x1c2   : > { %v688_v4 = vmax.f32 %v658_v0, 0.0 }
 0x1c3   : > { %v686_v6 = vmax.f32 %v650_v2, 0.0 }
 0x1c4   : > { %v698_v7 = vpack.c.bf16 %v688_v4, %v687_v3 }
 0x1c5   : > { %v697_v8 = vpack.c.bf16 %v686_v6, %v685_v5  ;;  %v2560_v9 = vpop.f32.mrb[12].mxu0 }
 0x1c6   : > { %v671_v10 = vadd.f32 %v2560_v9, %v2283_v30  ;;  %v662_v11 = vpop.f32.mrb[13].mxu0 }
 0x1c7   : > { %v663_v12 = vadd.f32 %v2283_v30, %v662_v11  ;;  %v2561_v13 = vpop.f32.mrb[14].mxu0  ;;  %2586 = vmatprep.mubr.bf16.mxu1 %v697_v8 }
 0x1c8   : > { %v674_v14 = vadd.f32 %v2561_v13, %v2283_v30  ;;  %v665_v15 = vpop.f32.mrb[15].mxu0  ;;  %2587 = vmatmul.mubr.bf16.gmra.mrb[8].mxu1 %v698_v7  ;;  %v691_v17 = vmax.f32 %v671_v10, 0.0 }
 0x1c9   : > { %v666_v16 = vadd.f32 %v2283_v30, %v665_v15  ;;  %v689_v19 = vmax.f32 %v663_v12, 0.0 }
 0x1ca   : > { %v692_v18 = vmax.f32 %v674_v14, 0.0 }
 0x1cb   : > { %v690_v20 = vmax.f32 %v666_v16, 0.0 }
 0x1cc   : > { %v700_v21 = vpack.c.bf16 %v692_v18, %v691_v17  ;;  %v3613_v18 = vld [vmem:[%s3552_s22] sm:$0xff]  }
 0x1cd   : > { %v699_v22 = vpack.c.bf16 %v690_v20, %v689_v19  ;;  %v2984_v19 = vld [vmem:[#allocation10 + $0x180] sm:$0xff]   ;;  %v2985_v20 = vld [vmem:[#allocation10 + $0x188] sm:$0xff]  }
 0x1ce   : > { %2690 = vmatprep.subr.bf16.mxu0 %v2984_v19 }
 0x1cf   : > { %2590 = vmatprep.mubr.bf16.mxu1 %v699_v22  ;;  %v2987_v22 = vld [vmem:[#allocation10 + $0x198] sm:$0xff]  }
 0x1d0   : > { %2591 = vmatmul.mubr.bf16.gmra.mrb[12].mxu1 %v700_v21  ;;  %v2986_v21 = vld [vmem:[#allocation10 + $0x190] sm:$0xff]  }
 0x1d1   : > { %2642 = vmatprep.mubr.bf16.mxu1 %v3613_v18 }
 0x28b   : > { %v2580_v26 = vpop.f32.mrb[0].mxu1 }
 0x28c   : > { %v817_v27 = vadd.f32 %v2580_v26, %v2301_v25  ;;  %v808_v28 = vpop.f32.mrb[1].mxu1 }
 0x28d   : > { %v809_v29 = vadd.f32 %v2301_v25, %v808_v28  ;;  %v2581_v30 = vpop.f32.mrb[2].mxu1 }
 0x28e   : > { %v820_v31 = vadd.f32 %v2581_v30, %v2301_v25  ;;  %v811_v32 = vpop.f32.mrb[3].mxu1  ;;  %v873_v34 = vmax.f32 %v817_v27, 0.0 }
 0x28f   : > { %v812_v33 = vadd.f32 %v2301_v25, %v811_v32  ;;  %v871_v36 = vmax.f32 %v809_v29, 0.0 }
 0x290   : > { %v874_v35 = vmax.f32 %v820_v31, 0.0 }
 0x291   : > { %v872_v37 = vmax.f32 %v812_v33, 0.0 }
 0x292   : > { %v3588_v38 = vpack.c.bf16 %v874_v35, %v873_v34 }
 0x293   : > { %v3590_v39 = vpack.c.bf16 %v872_v37, %v871_v36  ;;  %v2584_v40 = vpop.f32.mrb[4].mxu1 }
 0x294   : > { %v833_v41 = vadd.f32 %v2584_v40, %v2301_v25  ;;  %v824_v42 = vpop.f32.mrb[5].mxu1 }
 0x295   : > { %v825_v43 = vadd.f32 %v2301_v25, %v824_v42  ;;  %v2585_v44 = vpop.f32.mrb[6].mxu1  ;;  %2610 = vmatprep.mubr.bf16.mxu0 %v3590_v39 }
 0x296   : > { %v836_v45 = vadd.f32 %v2585_v44, %v2301_v25  ;;  %v827_v46 = vpop.f32.mrb[7].mxu1  ;;  %2611 = vmatmul.mubr.bf16.vlgmr.msra.gmra.mrb[16].mxu0 %v3588_v38  ;;  %v877_v48 = vmax.f32 %v833_v41, 0.0 }
 0x297   : > { %v828_v47 = vadd.f32 %v2301_v25, %v827_v46  ;;  %v875_v50 = vmax.f32 %v825_v43, 0.0  ;;  %2691 = vmatpush3.bf16.msra.mxu0 %v2984_v19  ;;  %v1394_v19 = vld [vmem:[%s3560_s26 + $0x30] sm:$0xff] }
 0x298   : > { %v878_v49 = vmax.f32 %v836_v45, 0.0  ;;  %2692 = vmatprep.subr.bf16.mxu0 %v2985_v20 }
 0x299   : > { %v876_v51 = vmax.f32 %v828_v47, 0.0 }
 0x29a   : > { %v3594_v52 = vpack.c.bf16 %v878_v49, %v877_v48 }
 0x29b   : > { %v3596_v53 = vpack.c.bf16 %v876_v51, %v875_v50  ;;  %v2588_v54 = vpop.f32.mrb[8].mxu1  ;;  %2693 = vmatpush3.bf16.msra.mxu0 %v2985_v20  ;;  %v2970_v51 = vld [vmem:[#allocation10 + $0xc0] sm:$0xff]  }
 0x29c   : > { %v849_v55 = vadd.f32 %v2588_v54, %v2301_v25  ;;  %v840_v56 = vpop.f32.mrb[9].mxu1  ;;  %2694 = vmatprep.subr.bf16.mxu0 %v2986_v21  ;;  %v3617_v54 = vld [vmem:[%s3552_s22 + $0x8] sm:$0xff]  }
 0x29d   : > { %v841_v57 = vadd.f32 %v2301_v25, %v840_v56  ;;  %v2589_v58 = vpop.f32.mrb[10].mxu1  ;;  %2614 = vmatprep.mubr.bf16.mxu0 %v3596_v53  ;;  %v2971_v56 = vld [vmem:[#allocation10 + $0xc8] sm:$0xff]  }
 0x29e   : > { %v852_v59 = vadd.f32 %v2589_v58, %v2301_v25  ;;  %v843_v60 = vpop.f32.mrb[11].mxu1  ;;  %2615 = vmatmul.mubr.bf16.gmra.mrb[20].mxu0 %v3594_v52  ;;  %v881_v62 = vmax.f32 %v849_v55, 0.0  ;;  %v3620_v55 = vld [vmem:[%s3552_s22 + $0x10] sm:$0xff]   ;;  %v3625_v58 = vld [vmem:[%s3552_s22 + $0x18] sm:$0xff]  }
 0x29f   : > { %v844_v61 = vadd.f32 %v2301_v25, %v843_v60  ;;  %v879_v0 = vmax.f32 %v841_v57, 0.0  ;;  %2695 = vmatpush3.bf16.msra.mxu0 %v2986_v21  ;;  %v2974_v57 = vld [vmem:[#allocation10 + $0xd0] sm:$0xff]   ;;  %v2975_v60 = vld [vmem:[#allocation10 + $0xd8] sm:$0xff]  }
 0x2a0   : > { %v882_v63 = vmax.f32 %v852_v59, 0.0  ;;  %2696 = vmatprep.subr.bf16.mxu0 %v2987_v22  ;;  %v3628_v59 = vld [vmem:[%s3552_s22 + $0x20] sm:$0xff]  }
 0x2a1   : > { %v880_v1 = vmax.f32 %v844_v61, 0.0  ;;  %v2978_v61 = vld [vmem:[#allocation10 + $0xe0] sm:$0xff]   ;;  %v1392_v21 = vld [vmem:[%s3560_s26 + $0x20] sm:$0xff] }
 0x2a2   : > { %v3600_v2 = vpack.c.bf16 %v882_v63, %v881_v62  ;;  %v3633_v62 = vld [vmem:[%s3552_s22 + $0x28] sm:$0xff]   ;;  %v3636_v63 = vld [vmem:[%s3552_s22 + $0x30] sm:$0xff]  }
 0x2a3   : > { %v3602_v3 = vpack.c.bf16 %v880_v1, %v879_v0  ;;  %v2592_v4 = vpop.f32.mrb[12].mxu1  ;;  %2697 = vmatpush3.bf16.msra.mxu0 %v2987_v22  ;;  %v2979_v0 = vld [vmem:[#allocation10 + $0xe8] sm:$0xff]   ;;  %v2982_v1 = vld [vmem:[#allocation10 + $0xf0] sm:$0xff]  }
 0x2a4   : > { %v865_v5 = vadd.f32 %v2592_v4, %v2301_v25  ;;  %v856_v6 = vpop.f32.mrb[13].mxu1  ;;  %2698 = vmatprep.subr.bf16.mxu0 %v2988_v23  ;;  %v3641_v4 = vld [vmem:[%s3552_s22 + $0x38] sm:$0xff]   ;;  %s2102_s22 = sshll.u32 %s438_s15, 4  ;;  %s3761_s22 = int_to_ptr.vmem [resolvable:$true] %s2102_s22 }
 0x2a5   : > { %v857_v7 = vadd.f32 %v2301_v25, %v856_v6  ;;  %v2593_v8 = vpop.f32.mrb[14].mxu1  ;;  %2618 = vmatprep.mubr.bf16.mxu0 %v3602_v3  ;;  %v2991_v6 = vld [vmem:[#allocation10 + $0x1b8] sm:$0xff]   ;;  %p3163_p11 = scmp.lt.s32.totalorder %s3761_s22, %s3161_s12 }
 0x2a6   : > { %v868_v9 = vadd.f32 %v2593_v8, %v2301_v25  ;;  %v859_v10 = vpop.f32.mrb[15].mxu1  ;;  %2619 = vmatmul.mubr.bf16.gmra.mrb[24].mxu0 %v3600_v2  ;;  %v885_v12 = vmax.f32 %v865_v5, 0.0  ;;  %v2983_v5 = vld [vmem:[#allocation10 + $0xf8] sm:$0xff]  }
 0x2a7   : > { %v860_v11 = vadd.f32 %v2301_v25, %v859_v10  ;;  %v883_v14 = vmax.f32 %v857_v7, 0.0  ;;  %2699 = vmatpush3.bf16.msra.mxu0 %v2988_v23 }
 0x2a8   : > { %v886_v13 = vmax.f32 %v868_v9, 0.0  ;;  %2700 = vmatprep.subr.bf16.mxu0 %v2989_v24 }
 0x2a9   : > { %v884_v15 = vmax.f32 %v860_v11, 0.0 }
 0x2aa   : > { %v3606_v16 = vpack.c.bf16 %v886_v13, %v885_v12 }
 0x2ab   : > { %v3608_v17 = vpack.c.bf16 %v884_v15, %v883_v14  ;;  %2701 = vmatpush3.bf16.msra.mxu0 %v2989_v24  ;;  %v1395_v24 = vld [vmem:[%s3560_s26 + $0x38] sm:$0xff] }
 0x2ad   : > { %2622 = vmatprep.mubr.bf16.mxu0 %v3608_v17 }
 0x2ae   : > { %2623 = vmatmul.mubr.bf16.gmra.mrb[28].mxu0 %v3606_v16 }
 0x369   : > { %v2612_v25 = vpop.f32.mrb[16].mxu0 }
 0x36a   : > { %v1027_v26 = vpop.f32.mrb[17].mxu0 }
 0x36b   : > { %v2613_v27 = vpop.f32.mrb[18].mxu0 }
 0x36c   : > { %v1091_v28 = vpack.c.bf16 %v2613_v27, %v2612_v25  ;;  %v1030_v29 = vpop.f32.mrb[19].mxu0  ;;  %v1393_v27 = vld [vmem:[%s3560_s26 + $0x28] sm:$0xff] }
 0x36d   : > { %v1090_v30 = vpack.c.bf16 %v1030_v29, %v1027_v26 }
 0x36f   : > { %2626 = vmatprep.subr.bf16.mxu1 %v1090_v30 }
 0x370   : > { %2627 = vmatpush3.bf16.msra.mxu1 %v1090_v30 }
 0x371   : > { %v2616_v31 = vpop.f32.mrb[20].mxu0  ;;  %2628 = vmatprep.subr.bf16.mxu1 %v1091_v28 }
 0x372   : > { %v1043_v32 = vpop.f32.mrb[21].mxu0 }
 0x373   : > { %v2617_v33 = vpop.f32.mrb[22].mxu0 }
 0x374   : > { %v1093_v34 = vpack.c.bf16 %v2617_v33, %v2616_v31  ;;  %v1046_v35 = vpop.f32.mrb[23].mxu0  ;;  %2629 = vmatpush3.bf16.msra.mxu1 %v1091_v28 }
 0x375   : > { %v1092_v36 = vpack.c.bf16 %v1046_v35, %v1043_v32 }
 0x377   : > { %2630 = vmatprep.subr.bf16.mxu1 %v1092_v36 }
 0x378   : > { %2631 = vmatpush3.bf16.msra.mxu1 %v1092_v36 }
 0x379   : > { %v2620_v37 = vpop.f32.mrb[24].mxu0  ;;  %2632 = vmatprep.subr.bf16.mxu1 %v1093_v34 }
 0x37a   : > { %v1059_v40 = vpop.f32.mrb[25].mxu0 }
 0x37b   : > { %v2621_v41 = vpop.f32.mrb[26].mxu0 }
 0x37c   : > { %v1095_v42 = vpack.c.bf16 %v2621_v41, %v2620_v37  ;;  %v1062_v43 = vpop.f32.mrb[27].mxu0  ;;  %2633 = vmatpush3.bf16.msra.mxu1 %v1093_v34  ;;  %v1398_v37 = vld [vmem:[%s3560_s26 + $0x50] sm:$0xff]  ;;  %v1396_v41 = vld [vmem:[%s3560_s26 + $0x40] sm:$0xff] }
 0x37d   : > { %v1094_v44 = vpack.c.bf16 %v1062_v43, %v1059_v40 }
 0x37f   : > { %2634 = vmatprep.subr.bf16.mxu1 %v1094_v44 }
 0x380   : > { %2635 = vmatpush3.bf16.msra.mxu1 %v1094_v44  ;;  %v1399_v44 = vld [vmem:[%s3560_s26 + $0x58] sm:$0xff] }
 0x381   : > { %v2624_v45 = vpop.f32.mrb[28].mxu0  ;;  %2636 = vmatprep.subr.bf16.mxu1 %v1095_v42 }
 0x382   : > { %v1075_v46 = vpop.f32.mrb[29].mxu0 }
 0x383   : > { %v2625_v47 = vpop.f32.mrb[30].mxu0 }
 0x384   : > { %v1097_v48 = vpack.c.bf16 %v2625_v47, %v2624_v45  ;;  %v1078_v49 = vpop.f32.mrb[31].mxu0  ;;  %2637 = vmatpush3.bf16.msra.mxu1 %v1095_v42  ;;  %v1397_v47 = vld [vmem:[%s3560_s26 + $0x48] sm:$0xff] }
 0x385   : > { %v1096_v50 = vpack.c.bf16 %v1078_v49, %v1075_v46 }
 0x387   : > { %2638 = vmatprep.subr.bf16.mxu1 %v1096_v50 }
 0x388   : > { %2639 = vmatpush3.bf16.msra.mxu1 %v1096_v50 }
 0x389   : > { %2640 = vmatprep.subr.bf16.mxu1 %v1097_v48 }
 0x38c   : > { %2641 = vmatpush3.bf16.msra.mxu1 %v1097_v48 }
 0x38d   : > { %2658 = vmatprep.subr.bf16.mxu1 %v2970_v51 }
 0x38f   : > { %2643 = vmatmul.mubr.bf16.vlgmr.msra.gmra.mrb[16].mxu1 %v3617_v54 }
 0x390   : > { %2659 = vmatpush3.bf16.msra.mxu1 %v2970_v51  ;;  %2646 = vmatprep.mubr.bf16.mxu1 %v3620_v55 }
 0x391   : > { %2660 = vmatprep.subr.bf16.mxu1 %v2971_v56 }
 0x394   : > { %2661 = vmatpush3.bf16.msra.mxu1 %v2971_v56 }
 0x395   : > { %2662 = vmatprep.subr.bf16.mxu1 %v2974_v57 }
 0x397   : > { %2647 = vmatmul.mubr.bf16.gmra.mrb[20].mxu1 %v3625_v58 }
 0x398   : > { %2663 = vmatpush3.bf16.msra.mxu1 %v2974_v57  ;;  %2650 = vmatprep.mubr.bf16.mxu1 %v3628_v59 }
 0x399   : > { %2664 = vmatprep.subr.bf16.mxu1 %v2975_v60 }
 0x39c   : > { %2665 = vmatpush3.bf16.msra.mxu1 %v2975_v60 }
 0x39d   : > { %2666 = vmatprep.subr.bf16.mxu1 %v2978_v61 }
 0x39f   : > { %2651 = vmatmul.mubr.bf16.gmra.mrb[24].mxu1 %v3633_v62 }
 0x3a0   : > { %2667 = vmatpush3.bf16.msra.mxu1 %v2978_v61  ;;  %2654 = vmatprep.mubr.bf16.mxu1 %v3636_v63 }
 0x3a1   : > { %2668 = vmatprep.subr.bf16.mxu1 %v2979_v0 }
 0x3a4   : > { %2669 = vmatpush3.bf16.msra.mxu1 %v2979_v0 }
 0x3a5   : > { %2670 = vmatprep.subr.bf16.mxu1 %v2982_v1 }
 0x3a7   : > { %2655 = vmatmul.mubr.bf16.gmra.mrb[28].mxu1 %v3641_v4 }
 0x3a8   : > { %2671 = vmatpush3.bf16.msra.mxu1 %v2982_v1  ;;  %2674 = vmatprep.mubr.bf16.mxu1 %v3590_v39  ;;  %v2990_v39 = vld [vmem:[#allocation10 + $0x1b0] sm:$0xff]   ;;  %v1402_v1 = vld [vmem:[%s3560_s26 + $0x70] sm:$0xff] }
 0x3a9   : > { %2672 = vmatprep.subr.bf16.mxu1 %v2983_v5  ;;  %2702 = vmatprep.subr.bf16.mxu0 %v2990_v39 }
 0x3aa   : > { %2703 = vmatpush3.bf16.msra.mxu0 %v2990_v39  ;;  %v1400_v39 = vld [vmem:[%s3560_s26 + $0x60] sm:$0xff] }
 0x3ab   : > { %2704 = vmatprep.subr.bf16.mxu0 %v2991_v6 }
 0x3ac   : > { %2673 = vmatpush3.bf16.msra.mxu1 %v2983_v5 }
 0x3ae   : > { %2705 = vmatpush3.bf16.msra.mxu0 %v2991_v6 }
 0x3af   : > { %2675 = vmatmul.mubr.bf16.vlgmr.msra.gmra.mrb[16].mxu1 %v3588_v38  ;;  %v1390_v38 = vld [vmem:[%s3560_s26 + $0x10] sm:$0xff] }
 0x3b0   : > { %2678 = vmatprep.mubr.bf16.mxu1 %v3596_v53  ;;  %v1388_v53 = vld [vmem:[%s3560_s26] sm:$0xff] }
 0x3b7   : > { %2679 = vmatmul.mubr.bf16.gmra.mrb[20].mxu1 %v3594_v52  ;;  %v1391_v52 = vld [vmem:[%s3560_s26 + $0x18] sm:$0xff] }
 0x3b8   : > { %2682 = vmatprep.mubr.bf16.mxu1 %v3602_v3 }
 0x3bf   : > { %2683 = vmatmul.mubr.bf16.gmra.mrb[24].mxu1 %v3600_v2  ;;  %v1389_v2 = vld [vmem:[%s3560_s26 + $0x8] sm:$0xff] }
 0x3c0   : > { %2686 = vmatprep.mubr.bf16.mxu1 %v3608_v17 }
 0x3c7   : > { %2687 = vmatmul.mubr.bf16.gmra.mrb[28].mxu1 %v3606_v16 }
 0x482   : > { %v2676_v7 = vpop.f32.mrb[16].mxu1 }
 0x483   : > { %v1406_v3 = vadd.f32 %v2676_v7, %v1390_v38  ;;  %v1325_v8 = vpop.f32.mrb[17].mxu1 }
 0x484   : > { %v1404_v9 = vadd.f32 %v1388_v53, %v1325_v8  ;;  %v2677_v10 = vpop.f32.mrb[18].mxu1  ;;  %v1403_v53 = vld [vmem:[%s3560_s26 + $0x78] sm:$0xff] }
 0x485   : > { %v1407_v11 = vadd.f32 %v2677_v10, %v1391_v52  ;;  %v1328_v12 = vpop.f32.mrb[19].mxu1  ;;  %v1422_v14 = vmax.f32 %v1406_v3, 0.0  ;;  %v1401_v3 = vld [vmem:[%s3560_s26 + $0x68] sm:$0xff] }
 0x486   : > { %v1405_v13 = vadd.f32 %v1389_v2, %v1328_v12  ;;  %v1420_v16 = vmax.f32 %v1404_v9, 0.0 }
 0x487   : > { %v1423_v15 = vmax.f32 %v1407_v11, 0.0 }
 0x488   : > { %v1421_v17 = vmax.f32 %v1405_v13, 0.0 }
 0x489   : > { %v3657_v20 = vpack.c.bf16 %v1423_v15, %v1422_v14 }
 0x48a   : > { %v3660_v22 = vpack.c.bf16 %v1421_v17, %v1420_v16  ;;  %v2680_v23 = vpop.f32.mrb[20].mxu1 }
 0x48b   : > { %v1410_v25 = vadd.f32 %v2680_v23, %v1394_v19  ;;  %v1341_v26 = vpop.f32.mrb[21].mxu1 }
 0x48c   : > { %v1408_v28 = vadd.f32 %v1392_v21, %v1341_v26  ;;  %v2681_v29 = vpop.f32.mrb[22].mxu1  ;;  %2706 = vmatprep.mubr.bf16.mxu0 %v3660_v22 }
 0x48d   : > { %v1411_v30 = vadd.f32 %v2681_v29, %v1395_v24  ;;  %v1344_v31 = vpop.f32.mrb[23].mxu1  ;;  %2707 = vmatmul.mubr.bf16.vlgmr.msra.gmra.mrb[32].mxu0 %v3657_v20  ;;  %v1426_v33 = vmax.f32 %v1410_v25, 0.0 }
 0x48e   : > { %v1409_v32 = vadd.f32 %v1393_v27, %v1344_v31  ;;  %v1424_v35 = vmax.f32 %v1408_v28, 0.0 }
 0x48f   : > { %v1427_v34 = vmax.f32 %v1411_v30, 0.0 }
 0x490   : > { %v1425_v36 = vmax.f32 %v1409_v32, 0.0 }
 0x491   : > { %v3667_v40 = vpack.c.bf16 %v1427_v34, %v1426_v33 }
 0x492   : > { %v3670_v42 = vpack.c.bf16 %v1425_v36, %v1424_v35  ;;  %v2684_v43 = vpop.f32.mrb[24].mxu1 }
 0x493   : > { %v1414_v45 = vadd.f32 %v2684_v43, %v1398_v37  ;;  %v1357_v46 = vpop.f32.mrb[25].mxu1 }
 0x494   : > { %v1412_v48 = vadd.f32 %v1396_v41, %v1357_v46  ;;  %v2685_v49 = vpop.f32.mrb[26].mxu1  ;;  %2710 = vmatprep.mubr.bf16.mxu0 %v3670_v42 }
 0x495   : > { %v1415_v50 = vadd.f32 %v2685_v49, %v1399_v44  ;;  %v1360_v51 = vpop.f32.mrb[27].mxu1  ;;  %2711 = vmatmul.mubr.bf16.gmra.mrb[36].mxu0 %v3667_v40  ;;  %v1430_v57 = vmax.f32 %v1414_v45, 0.0  ;;  %v2993_v49 = vld [vmem:[#allocation10 + $0x148] sm:$0xff]  }
 0x496   : > { %v1413_v56 = vadd.f32 %v1397_v47, %v1360_v51  ;;  %v1428_v61 = vmax.f32 %v1412_v48, 0.0  ;;  %v2992_v48 = vld [vmem:[#allocation10 + $0x140] sm:$0xff]   ;;  %v2995_v51 = vld [vmem:[#allocation10 + $0x158] sm:$0xff]  }
 0x497   : > { %v1431_v60 = vmax.f32 %v1415_v50, 0.0  ;;  %v2994_v50 = vld [vmem:[#allocation10 + $0x150] sm:$0xff]  }
 0x498   : > { %v1429_v0 = vmax.f32 %v1413_v56, 0.0  ;;  %v2996_v56 = vld [vmem:[#allocation10 + $0x160] sm:$0xff]  }
 0x499   : > { %v3677_v5 = vpack.c.bf16 %v1431_v60, %v1430_v57  ;;  %v2997_v57 = vld [vmem:[#allocation10 + $0x168] sm:$0xff]  }
 0x49a   : > { %v3680_v6 = vpack.c.bf16 %v1429_v0, %v1428_v61  ;;  %v2688_v38 = vpop.f32.mrb[28].mxu1 }
 0x49b   : > { %v1418_v7 = vadd.f32 %v2688_v38, %v1402_v1  ;;  %v1373_v52 = vpop.f32.mrb[29].mxu1 }
 0x49c   : > { %v1416_v8 = vadd.f32 %v1400_v39, %v1373_v52  ;;  %v2689_v2 = vpop.f32.mrb[30].mxu1  ;;  %2714 = vmatprep.mubr.bf16.mxu0 %v3680_v6  ;;  %v2354_v52 = vld [vmem:[%s3560_s26 + $0xa0] sm:$0xff] }
 0x49d   : > { %v1419_v9 = vadd.f32 %v2689_v2, %v1403_v53  ;;  %v1376_v10 = vpop.f32.mrb[31].mxu1  ;;  %2715 = vmatmul.mubr.bf16.gmra.mrb[40].mxu0 %v3677_v5  ;;  %v1434_v12 = vmax.f32 %v1418_v7, 0.0  ;;  %v2356_v53 = vld [vmem:[%s3560_s26 + $0xb0] sm:$0xff]  ;;  %v2357_v2 = vld [vmem:[%s3560_s26 + $0xb8] sm:$0xff] }
 0x49e   : > { %v1417_v11 = vadd.f32 %v1401_v3, %v1376_v10  ;;  %v1432_v14 = vmax.f32 %v1416_v8, 0.0 }
 0x49f   : > { %v1435_v13 = vmax.f32 %v1419_v9, 0.0 }
 0x4a0   : > { %v1433_v15 = vmax.f32 %v1417_v11, 0.0  ;;  %v2355_v11 = vld [vmem:[%s3560_s26 + $0xa8] sm:$0xff] }
 0x4a1   : > { %v3686_v16 = vpack.c.bf16 %v1435_v13, %v1434_v12 }
 0x4a2   : > { %v3688_v17 = vpack.c.bf16 %v1433_v15, %v1432_v14 }
 0x4a4   : > { %2718 = vmatprep.mubr.bf16.mxu0 %v3688_v17 }
 0x4a5   : > { %2719 = vmatmul.mubr.bf16.gmra.mrb[44].mxu0 %v3686_v16 }
 0x4a6   : > { %2738 = vmatprep.mubr.bf16.mxu0 %v3613_v18 }
 0x560   : > { %v2708_v19 = vpop.f32.mrb[32].mxu0 }
 0x561   : > { %v1560_v21 = vpop.f32.mrb[33].mxu0 }
 0x562   : > { %v2709_v23 = vpop.f32.mrb[34].mxu0 }
 0x563   : > { %v1624_v24 = vpack.c.bf16 %v2709_v23, %v2708_v19  ;;  %v1563_v25 = vpop.f32.mrb[35].mxu0 }
 0x564   : > { %v1623_v26 = vpack.c.bf16 %v1563_v25, %v1560_v21 }
 0x566   : > { %2722 = vmatprep.subr.bf16.mxu0 %v1623_v26 }
 0x567   : > { %2723 = vmatpush3.bf16.msra.mxu0 %v1623_v26  ;;  %v2358_v26 = vld [vmem:[%s3560_s26 + $0xc0] sm:$0xff] }
 0x568   : > { %v2712_v27 = vpop.f32.mrb[36].mxu0  ;;  %2724 = vmatprep.subr.bf16.mxu0 %v1624_v24 }
 0x569   : > { %v1576_v28 = vpop.f32.mrb[37].mxu0 }
 0x56a   : > { %v2713_v29 = vpop.f32.mrb[38].mxu0 }
 0x56b   : > { %v1626_v30 = vpack.c.bf16 %v2713_v29, %v2712_v27  ;;  %v1579_v31 = vpop.f32.mrb[39].mxu0  ;;  %2725 = vmatpush3.bf16.msra.mxu0 %v1624_v24  ;;  %v2360_v24 = vld [vmem:[%s3560_s26 + $0xd0] sm:$0xff]  ;;  %v2361_v29 = vld [vmem:[%s3560_s26 + $0xd8] sm:$0xff] }
 0x56c   : > { %v1625_v32 = vpack.c.bf16 %v1579_v31, %v1576_v28 }
 0x56e   : > { %2726 = vmatprep.subr.bf16.mxu0 %v1625_v32 }
 0x56f   : > { %2727 = vmatpush3.bf16.msra.mxu0 %v1625_v32  ;;  %v2359_v32 = vld [vmem:[%s3560_s26 + $0xc8] sm:$0xff] }
 0x570   : > { %v2716_v33 = vpop.f32.mrb[40].mxu0  ;;  %2728 = vmatprep.subr.bf16.mxu0 %v1626_v30 }
 0x571   : > { %v1592_v18 = vpop.f32.mrb[41].mxu0 }
 0x572   : > { %v2717_v34 = vpop.f32.mrb[42].mxu0 }
 0x573   : > { %v1628_v35 = vpack.c.bf16 %v2717_v34, %v2716_v33  ;;  %v1595_v36 = vpop.f32.mrb[43].mxu0  ;;  %2729 = vmatpush3.bf16.msra.mxu0 %v1626_v30 }
 0x574   : > { %v1627_v37 = vpack.c.bf16 %v1595_v36, %v1592_v18 }
 0x576   : > { %2730 = vmatprep.subr.bf16.mxu0 %v1627_v37 }
 0x577   : > { %2731 = vmatpush3.bf16.msra.mxu0 %v1627_v37 }
 0x578   : > { %v2720_v41 = vpop.f32.mrb[44].mxu0  ;;  %2732 = vmatprep.subr.bf16.mxu0 %v1628_v35 }
 0x579   : > { %v1608_v43 = vpop.f32.mrb[45].mxu0 }
 0x57a   : > { %v2721_v44 = vpop.f32.mrb[46].mxu0 }
 0x57b   : > { %v1630_v45 = vpack.c.bf16 %v2721_v44, %v2720_v41  ;;  %v1611_v46 = vpop.f32.mrb[47].mxu0  ;;  %2733 = vmatpush3.bf16.msra.mxu0 %v1628_v35 }
 0x57c   : > { %v1629_v47 = vpack.c.bf16 %v1611_v46, %v1608_v43 }
 0x57e   : > { %2734 = vmatprep.subr.bf16.mxu0 %v1629_v47 }
 0x57f   : > { %2735 = vmatpush3.bf16.msra.mxu0 %v1629_v47  ;;  %v2362_v47 = vld [vmem:[%s3560_s26 + $0xe0] sm:$0xff] }
 0x580   : > { %2736 = vmatprep.subr.bf16.mxu0 %v1630_v45 }
 0x583   : > { %2737 = vmatpush3.bf16.msra.mxu0 %v1630_v45  ;;  %v2364_v45 = vld [vmem:[%s3560_s26 + $0xf0] sm:$0xff] }
 0x584   : > { %2754 = vmatprep.subr.bf16.mxu0 %v2992_v48 }
 0x586   : > { %2739 = vmatmul.mubr.bf16.vlgmr.msra.gmra.mrb[48].mxu0 %v3617_v54  ;;  %v2998_v54 = vld [vmem:[#allocation10 + $0x170] sm:$0xff]  }
 0x587   : > { %2755 = vmatpush3.bf16.msra.mxu0 %v2992_v48  ;;  %2742 = vmatprep.mubr.bf16.mxu0 %v3620_v55  ;;  %v2999_v55 = vld [vmem:[#allocation10 + $0x178] sm:$0xff]  }
 0x588   : > { %2756 = vmatprep.subr.bf16.mxu0 %v2993_v49 }
 0x58b   : > { %2757 = vmatpush3.bf16.msra.mxu0 %v2993_v49 }
 0x58c   : > { %2758 = vmatprep.subr.bf16.mxu0 %v2994_v50 }
 0x58e   : > { %2743 = vmatmul.mubr.bf16.gmra.mrb[52].mxu0 %v3625_v58  ;;  %v3245_v58 = vmov 0.0  }
 0x58f   : > { %2759 = vmatpush3.bf16.msra.mxu0 %v2994_v50  ;;  %2746 = vmatprep.mubr.bf16.mxu0 %v3628_v59  ;;  %v2352_v59 = vld [vmem:[%s3560_s26 + $0x90] sm:$0xff]  ;;  %v2365_v50 = vld [vmem:[%s3560_s26 + $0xf8] sm:$0xff] }
 0x590   : > { %2760 = vmatprep.subr.bf16.mxu0 %v2995_v51  ;;  %2786 = vmatprep.subr.bf16.mxu1 %v3245_v58 }
 0x591   : > { %2802 = vmatprep.mubr.msk.bf16.mxu1 %vm3246_vm0, %v3245_v58 }
 0x593   : > { %2761 = vmatpush3.bf16.msra.mxu0 %v2995_v51 }
 0x594   : > { %2762 = vmatprep.subr.bf16.mxu0 %v2996_v56 }
 0x596   : > { %2747 = vmatmul.mubr.bf16.gmra.mrb[56].mxu0 %v3633_v62  ;;  %v2350_v62 = vld [vmem:[%s3560_s26 + $0x80] sm:$0xff] }
 0x597   : > { %2763 = vmatpush3.bf16.msra.mxu0 %v2996_v56  ;;  %2750 = vmatprep.mubr.bf16.mxu0 %v3636_v63 }
 0x598   : > { %2764 = vmatprep.subr.bf16.mxu0 %v2997_v57 }
 0x59b   : > { %2765 = vmatpush3.bf16.msra.mxu0 %v2997_v57  ;;  %v2363_v57 = vld [vmem:[%s3560_s26 + $0xe8] sm:$0xff] }
 0x59c   : > { %2766 = vmatprep.subr.bf16.mxu0 %v2998_v54 }
 0x59e   : > { %2751 = vmatmul.mubr.bf16.gmra.mrb[60].mxu0 %v3641_v4  ;;  %v2353_v4 = vld [vmem:[%s3560_s26 + $0x98] sm:$0xff] }
 0x59f   : > { %2767 = vmatpush3.bf16.msra.mxu0 %v2998_v54  ;;  %2770 = vmatprep.mubr.bf16.mxu0 %v3660_v22 }
 0x5a0   : > { %2768 = vmatprep.subr.bf16.mxu0 %v2999_v55 }
 0x5a3   : > { %2769 = vmatpush3.bf16.msra.mxu0 %v2999_v55 }
 0x5a6   : > { %2771 = vmatmul.mubr.bf16.vlgmr.msra.gmra.mrb[48].mxu0 %v3657_v20 }
 0x5a7   : > { %2774 = vmatprep.mubr.bf16.mxu0 %v3670_v42 }
 0x5ae   : > { %2775 = vmatmul.mubr.bf16.gmra.mrb[52].mxu0 %v3667_v40  ;;  %v2351_v40 = vld [vmem:[%s3560_s26 + $0x88] sm:$0xff] }
 0x5af   : > { %2778 = vmatprep.mubr.bf16.mxu0 %v3680_v6 }
 0x5b6   : > { %2779 = vmatmul.mubr.bf16.gmra.mrb[56].mxu0 %v3677_v5 }
 0x5b7   : > { %2782 = vmatprep.mubr.bf16.mxu0 %v3688_v17 }
 0x5be   : > { %2783 = vmatmul.mubr.bf16.gmra.mrb[60].mxu0 %v3686_v16 }
 0x679   : > { %v2772_v63 = vpop.f32.mrb[48].mxu0 }
 0x67a   : > { %v1892_v20 = vadd.f32 %v2772_v63, %v2352_v59  ;;  %v1810_v22 = vpop.f32.mrb[49].mxu0 }
 0x67b   : > { %v1890_v42 = vadd.f32 %v2350_v62, %v1810_v22  ;;  %v2773_v60 = vpop.f32.mrb[50].mxu0 }
 0x67c   : > { %v1893_v61 = vadd.f32 %v2773_v60, %v2353_v4  ;;  %v1813_v0 = vpop.f32.mrb[51].mxu0  ;;  %v1908_v5 = vmax.f32 %v1892_v20, 0.0 }
 0x67d   : > { %v1891_v1 = vadd.f32 %v2351_v40, %v1813_v0  ;;  %v1906_v6 = vmax.f32 %v1890_v42, 0.0  ;;  %v3000_v0 = vld [vmem:[#allocation10 + $0x80] sm:$0xff]  }
 0x67e   : > { %v1909_v39 = vmax.f32 %v1893_v61, 0.0  ;;  %v1930_v61 = vld [vmem:[%s443_s5] sm:$0xf] }
 0x67f   : > { %v1907_v38 = vmax.f32 %v1891_v1, 0.0  ;;  %v3001_v1 = vld [vmem:[#allocation10 + $0x88] sm:$0xff]  }
 0x680   : > { %v1923_v7 = vpack.c.bf16 %v1909_v39, %v1908_v5  ;;  %v3002_v5 = vld [vmem:[#allocation10 + $0x90] sm:$0xff]   ;;  %v3003_v39 = vld [vmem:[#allocation10 + $0x98] sm:$0xff]  }
 0x681   : > { %v1922_v3 = vpack.c.bf16 %v1907_v38, %v1906_v6  ;;  %v2776_v8 = vpop.f32.mrb[52].mxu0  ;;  %v3004_v6 = vld [vmem:[#allocation10 + $0xa0] sm:$0xff]   ;;  %v3005_v38 = vld [vmem:[#allocation10 + $0xa8] sm:$0xff]  }
 0x682   : > { %v1896_v9 = vadd.f32 %v2776_v8, %v2356_v53  ;;  %v1826_v10 = vpop.f32.mrb[53].mxu0  ;;  %v3006_v53 = vld [vmem:[#allocation10 + $0xb0] sm:$0xff]  }
 0x683   : > { %v1894_v12 = vadd.f32 %v2354_v52, %v1826_v10  ;;  %v2777_v13 = vpop.f32.mrb[54].mxu0  ;;  %2787 = vmatpush3.bf16.msra.mxu1 %v1922_v3  ;;  %v1971_v52 = vld [vmem:[%s3564_s23] sm:$0xff]  ;;  %s3156_s23 = scalar_lea.vmem %s3761_s22, 128 }
 0x684   : > { %v1897_v14 = vadd.f32 %v2777_v13, %v2357_v2  ;;  %v1829_v15 = vpop.f32.mrb[55].mxu0  ;;  %2788 = vmatprep.subr.bf16.mxu1 %v3245_v58  ;;  %v1912_v17 = vmax.f32 %v1896_v9, 0.0  ;;  %p3157_p10 = scmp.ne.s32.totalorder %s3761_s22, %s3156_s23  ;;  %p3164_p4 = scmp.lt.s32.totalorder %s3162_s17, %s3156_s23 }
 0x685   : > { %v1895_v16 = vadd.f32 %v2355_v11, %v1829_v15  ;;  %v1910_v21 = vmax.f32 %v1894_v12, 0.0  ;;  %v2367_v12 = vld [vmem:[%s3809_s6 + $0x2] ss:$0 sm:$0xff] }
 0x686   : > { %v1913_v19 = vmax.f32 %v1897_v14, 0.0  ;;  %p3158_p1 = pnand %p3157_p10, %p3852_p8  ;;  %p3165_p13 = por %p3164_p4, %p3163_p11 }
 0x687   : > { %v1911_v23 = vmax.f32 %v1895_v16, 0.0  ;;  %2789 = vmatpush3.bf16.msra.mxu1 %v1923_v7  ;;  %v3007_v7 = vld [vmem:[#allocation10 + $0xb8] sm:$0xff]  }
 0x688   : > { %v1925_v25 = vpack.c.bf16 %v1913_v19, %v1912_v17  ;;  %2790 = vmatprep.subr.bf16.mxu1 %v3245_v58  ;;  %p3159_p5 = pneg %p3158_p1 }
 0x689   : > { %v1924_v27 = vpack.c.bf16 %v1911_v23, %v1910_v21  ;;  %v2780_v28 = vpop.f32.mrb[56].mxu0 }
 0x68a   : > { %v1900_v30 = vadd.f32 %v2780_v28, %v2360_v24  ;;  %v1842_v31 = vpop.f32.mrb[57].mxu0  ;;  %p3166_p2 = pnand %p3165_p13, %p3159_p5 }
 0x68b   : > { %v1898_v33 = vadd.f32 %v2358_v26, %v1842_v31  ;;  %v2781_v18 = vpop.f32.mrb[58].mxu0  ;;  %2791 = vmatpush3.bf16.msra.mxu1 %v1924_v27 }
 0x68c   : > { %v1901_v34 = vadd.f32 %v2781_v18, %v2361_v29  ;;  %v1845_v35 = vpop.f32.mrb[59].mxu0  ;;  %2792 = vmatprep.subr.bf16.mxu1 %v3245_v58  ;;  %v1916_v37 = vmax.f32 %v1900_v30, 0.0 }
 0x68d   : > { %v1899_v36 = vadd.f32 %v2359_v32, %v1845_v35  ;;  %v1914_v43 = vmax.f32 %v1898_v33, 0.0 }
 0x68e   : > { %v1917_v41 = vmax.f32 %v1901_v34, 0.0 }
 0x68f   : > { %v1915_v44 = vmax.f32 %v1899_v36, 0.0  ;;  %2793 = vmatpush3.bf16.msra.mxu1 %v1925_v25 }
 0x690   : > { %v1927_v46 = vpack.c.bf16 %v1917_v41, %v1916_v37  ;;  %2794 = vmatprep.subr.bf16.mxu1 %v3245_v58 }
 0x691   : > { %v1926_v48 = vpack.c.bf16 %v1915_v44, %v1914_v43  ;;  %v2784_v49 = vpop.f32.mrb[60].mxu0 }
 0x692   : > { %v1904_v51 = vadd.f32 %v2784_v49, %v2364_v45  ;;  %v1858_v56 = vpop.f32.mrb[61].mxu0 }
 0x693   : > { %v1902_v54 = vadd.f32 %v2362_v47, %v1858_v56  ;;  %v2785_v55 = vpop.f32.mrb[62].mxu0  ;;  %2795 = vmatpush3.bf16.msra.mxu1 %v1926_v48 }
 0x694   : > { %v1905_v59 = vadd.f32 %v2785_v55, %v2365_v50  ;;  %v1861_v62 = vpop.f32.mrb[63].mxu0  ;;  %2796 = vmatprep.subr.bf16.mxu1 %v3245_v58  ;;  %v1920_v4 = vmax.f32 %v1904_v51, 0.0 }
 0x695   : > { %v1903_v63 = vadd.f32 %v2363_v57, %v1861_v62  ;;  %v1918_v22 = vmax.f32 %v1902_v54, 0.0 }
 0x696   : > { %v1921_v20 = vmax.f32 %v1905_v59, 0.0 }
 0x697   : > { %v1919_v40 = vmax.f32 %v1903_v63, 0.0  ;;  %2797 = vmatpush3.bf16.msra.mxu1 %v1927_v46 }
 0x698   : > { %v1929_v42 = vpack.c.bf16 %v1921_v20, %v1920_v4  ;;  %2798 = vmatprep.subr.bf16.mxu1 %v3245_v58 }
 0x699   : > { %v1928_v60 = vpack.c.bf16 %v1919_v40, %v1918_v22 }
 0x69b   : > { %2799 = vmatpush3.bf16.msra.mxu1 %v1928_v60 }
 0x69c   : > { %2800 = vmatprep.subr.bf16.mxu1 %v3245_v58 }
 0x69f   : > { %2801 = vmatpush3.bf16.msra.mxu1 %v1929_v42 }
 0x6a0   : > { %2806 = vmatprep.subr.bf16.mxu1 %v3245_v58 }
 0x6a2   : > { %2803 = vmatmul.mubr.bf16.vlgmr.msra.gmra.mrb[32].mxu1 %v1930_v61 }
 0x6a3   : > { %2807 = vmatpush3.bf16.msra.mxu1 %v3000_v0  ;;  %2822 = vmatprep.mubr.msk.bf16.mxu1 %vm3246_vm0, %v3245_v58 }
 0x6a4   : > { %2808 = vmatprep.subr.bf16.mxu1 %v3245_v58 }
 0x6a7   : > { %2809 = vmatpush3.bf16.msra.mxu1 %v3001_v1 }
 0x6a8   : > { %2810 = vmatprep.subr.bf16.mxu1 %v3245_v58 }
 0x6ab   : > { %2811 = vmatpush3.bf16.msra.mxu1 %v3002_v5 }
 0x6ac   : > { %2812 = vmatprep.subr.bf16.mxu1 %v3245_v58 }
 0x6af   : > { %2813 = vmatpush3.bf16.msra.mxu1 %v3003_v39 }
 0x6b0   : > { %2814 = vmatprep.subr.bf16.mxu1 %v3245_v58 }
 0x6b3   : > { %2815 = vmatpush3.bf16.msra.mxu1 %v3004_v6 }
 0x6b4   : > { %2816 = vmatprep.subr.bf16.mxu1 %v3245_v58 }
 0x6b7   : > { %2817 = vmatpush3.bf16.msra.mxu1 %v3005_v38 }
 0x6b8   : > { %2818 = vmatprep.subr.bf16.mxu1 %v3245_v58 }
 0x6bb   : > { %2819 = vmatpush3.bf16.msra.mxu1 %v3006_v53 }
 0x6bc   : > { %2820 = vmatprep.subr.bf16.mxu1 %v3245_v58 }
 0x6bf   : > { %2821 = vmatpush3.bf16.msra.mxu1 %v3007_v7 }
 0x775   : > { %v1965_v3 = vpop.f32.mrb[32].mxu1 }
 0x776   : > { %v1972_v8 = vmul.f32 %v1971_v52, %v1965_v3  ;;  %v2804_v2 = vpop.f32.mrb[33].mxu1 }
 0x777   : > { %v1968_v9 = vpop.f32.mrb[34].mxu1 }
 0x778   : > { %v1973_v10 = vpack.c.bf16 %v1972_v8, %v1972_v8  ;;  %v2805_v11 = vpop.f32.mrb[35].mxu1 }
 0x77a   : > { %2823 = vmatmul.mubr.bf16.vlgmr.msra.gmra.mrb[36].mxu1 %v1973_v10 }
 0x84d   : > { %v2081_v58 = vpop.f32.mrb[36].mxu1 }
 0x84e   : > { %v2082_v13 = vadd.f32 %v2367_v12, %v2081_v58  ;;  %v2824_v14 = vpop.f32.mrb[37].mxu1 }
 0x84f   : > { %v2084_v15 = vpop.f32.mrb[38].mxu1 }
 0x850   : > { %2087 = vst [vmem:[%s438_s15] sm:$0xff] %v2082_v13  ;;  %v2825_v16 = vpop.f32.mrb[39].mxu1 }
 0x851   : > { %3169 = shalt.err (!%p3166_p2)
}
 0x852   : > { %s3170_s21 = scalar_lea.hbm %s3759_s19, 128  ;;  %s3174_s16 = scalar_lea.hbm %s3810_s7, 256 }
 0x853   : > { %p3171_p3 = scmp.ne.s32.totalorder %s3759_s19, %s3170_s21  ;;  %p3175_p6 = scmp.lt.u32.totalorder %s3759_s19, %s3810_s7 }
 0x854   : > { %p3176_p7 = scmp.lt.u32.totalorder %s3174_s16, %s3170_s21  ;;  %p3178_p10 = scmp.lt.u32.totalorder %s3170_s21, %s3759_s19 }
 0x855   : > { %p3172_p0 = pnand %p3171_p3, %p3852_p8 }
 0x856   : > { %p3177_p9 = por %p3176_p7, %p3175_p6 }
 0x857   : > { %p3173_p12 = pneg %p3172_p0 }
 0x858   : > { %p3179_p1 = por %p3178_p10, %p3177_p9 }
 0x85a   : > { %p3180_p5 = pnand %p3179_p1, %p3173_p12 }
 0x85c   : > { %3183 = shalt.err (!%p3180_p5)
}
 0x85d   : > { %2870 = dma.vmem_to_hbm [thread:$0]  (%p3852_p8), %s3761_s22, 128, %s3759_s19, %s2089_s28  }
 0x85e PF: > { %s3853_s30 = sld [smem:[#allocation20_spill]]  ;;  %s2114_s5 = sand.u32 1, %s3222_s24  }
 0x85f   : > { %p3855_p4 = scmp.ge.s32.totalorder %s3234_s27, 2  ;;  %s2115_s29 = scalar_lea.sflag [#allocation4], %s2114_s5 }
 0x864   : > { %p3854_p11 = scmp.ne.s32.totalorder %s3853_s30, 0 }
 0x866   : > { %p2890_p13 = pnand %p3855_p4, %p3854_p11 }
 0x868   : > { %3217 = dma.done.wait (!%p2890_p13), %s2115_s29, 128  }
 0x869   : > { %3219 = vsyncadd (!%p2890_p13), %s2115_s29, 4294967168  ;;  %s3856_s27 = sld [smem:[#allocation18_spill]]  ;;  %s3857_s11 = sld [smem:[#allocation17_spill]] }
 0x86a   : > { %s3858_s26 = sld [smem:[#allocation19_spill]]  ;;  %s3859_s24 = smov %s3226_s25 }
 0x86f   : > { %p26_p2 = scmp.ge.s32.totalorder %s3856_s27, 4   ;;  %s3860_s25 = smov %s3857_s11 }
 0x871   :  { %28 = sbr.rel (!%p26_p2) target bundleno = 12 (0xc), region = 146 }
 0x878   :  { %2120 = vsyncpa [#allocation3], 1 }
 0x879   :  { %2122 = vsyncpa [#allocation3 + $0x1], 1 }
 0x87a   :  { %2123 = vsyncpa [#allocation6], 1 }
 0x87b   :  { %2125 = vsyncpa [#allocation6 + $0x1], 1 }
 0x87c   :  { %2126 = vsyncpa [#allocation9], 1 }
 0x87d   :  { %2128 = vsyncpa [#allocation9 + $0x1], 1 }
 0x87e   :  { %2129 = vsyncpa [#allocation4], 1 }
 0x87f   :  { %2131 = vsyncpa [#allocation4 + $0x1], 1 }

</bundles_post_ra>
